<compile_context>
chip_gen: v5e
topology: v5e:2x2
jax: 0.10.0
libtpu: 0.0.40
codegen_flags: <defaults>
</compile_context>

<pallas_src>
import functools

import jax
import jax.numpy as jnp
from jax.experimental import pallas as pl
from jax.experimental.pallas import tpu as pltpu

HIDDEN = 256         # config['hidden_size']
INTERMEDIATE = 1024  # config['intermediate_size']
INIT_RANGE = 0.02    # config['initializer_range']


def _round_up(x, m):
    return ((x + m - 1) // m) * m


def _default_gelu_dtype():
    """bf16 GELU chain on v6e/v7x (bf16 VPU/EUP); f32 on v5e (no bf16 VALU/EUP,
    MXU-bound at these shapes so f32 elementwise is free filler)."""
    try:
        kind = jax.devices()[0].device_kind.lower()
    except Exception:
        return jnp.bfloat16
    if "v5 lite" in kind or "v5e" in kind or "v5litepod" in kind:
        return jnp.float32
    return jnp.bfloat16


def mlp_kernel(x_ref, w1_ref, b1_ref, w2_ref, b2_ref, o_ref, *, gelu_dtype):
    """Fused dense_1 -> x*sigmoid(1.702x) -> dense_2 (dropout = identity)."""
    # Cast activations to bf16 in-kernel (saves a wrapper-side HBM pass).
    x = x_ref[...].astype(jnp.bfloat16)                       # (TM, H)

    # dense_1: (TM, H) @ (H, I) on the MXU, f32 accumulation, f32 bias add.
    h = jnp.dot(x, w1_ref[...], preferred_element_type=jnp.float32)
    h = h + b1_ref[...]                                       # (TM, I) f32

    # NewGELUActivation from the module: x * sigmoid(1.702 * x).
    h = h.astype(gelu_dtype)
    g = h * jax.nn.sigmoid(1.702 * h)

    # dense_2: (TM, I) @ (I, H) on the MXU (K-reduction inside the MXU),
    # f32 accumulation + f32 bias add.
    out = jnp.dot(g.astype(jnp.bfloat16), w2_ref[...],
                  preferred_element_type=jnp.float32)
    out = out + b2_ref[...]                                   # (TM, H) f32

    # TODO(synk): nn.Dropout(p=0.1) — identity in eval mode; training-mode
    # dropout is not implemented here.
    o_ref[...] = out.astype(o_ref.dtype)


@functools.partial(jax.jit, static_argnames=("tile_m", "gelu_dtype"))
def mlp_forward(x, w1_bf, b1, w2_bf, b2, *, tile_m=512,
                gelu_dtype=jnp.bfloat16):
    """x: (B, S, H) f32.  w1_bf: (H, I) bf16, b1: (I,), w2_bf: (I, H) bf16, b2: (H,).

    Weights are expected pre-cast to bf16 (done once at param setup, not per
    call).  Biases stay f32.
    """
    B, S, H = x.shape
    inter = w1_bf.shape[1]
    M = B * S

    # Clamp tile_m for tiny inputs; keep the sublane dim a multiple of 8.
    # Default 512 is a multiple of 256 (v6e/v7x MXU) and keeps the grid >= 2
    # steps for M >= 1024 so ('parallel',) can shard across v7x's 2 cores.
    tm = min(tile_m, _round_up(M, 8))

    x2d = x.reshape(M, H)                          # no dtype cast here
    b1_2d = b1.reshape(1, inter).astype(jnp.float32)
    b2_2d = b2.reshape(1, H).astype(jnp.float32)

    grid = (pl.cdiv(M, tm),)
    kernel = functools.partial(mlp_kernel, gelu_dtype=gelu_dtype)

    cost = pl.CostEstimate(
        flops=4 * M * H * inter,                   # two matmuls, 2*M*H*I each
        transcendentals=M * inter,                 # one sigmoid per intermediate
        bytes_accessed=(M * H * x.dtype.itemsize   # x in
                        + M * H * x.dtype.itemsize # out
                        + H * inter * 2            # w1 bf16
                        + inter * H * 2            # w2 bf16
                        + inter * 4 + H * 4),      # biases f32
    )

    out2d = pl.pallas_call(
        kernel,
        out_shape=jax.ShapeDtypeStruct((M, H), x.dtype),
        grid_spec=pltpu.PrefetchScalarGridSpec(
            num_scalar_prefetch=0,
            grid=grid,
            in_specs=[
                # activation rows: streamed, double-buffered by default
                pl.BlockSpec((tm, H), lambda i: (i, 0)),
                # weights / biases: constant index_map -> VMEM-resident,
                # single-buffered (no wasted second copy)
                pl.BlockSpec((H, inter), lambda i: (0, 0),
                             pipeline_mode=pl.Buffered(1)),
                pl.BlockSpec((1, inter), lambda i: (0, 0),
                             pipeline_mode=pl.Buffered(1)),
                pl.BlockSpec((inter, H), lambda i: (0, 0),
                             pipeline_mode=pl.Buffered(1)),
                pl.BlockSpec((1, H), lambda i: (0, 0),
                             pipeline_mode=pl.Buffered(1)),
            ],
            out_specs=pl.BlockSpec((tm, H), lambda i: (i, 0)),
        ),
        compiler_params=pltpu.CompilerParams(
            dimension_semantics=("parallel",),
            vmem_limit_bytes=32 * 1024 * 1024,
        ),
        cost_estimate=cost,
    )(x2d, w1_bf, b1_2d, w2_bf, b2_2d)
    return out2d.reshape(B, S, H)


def init_params(key):
    """Deterministic f32 params matching nn.Linear shapes (weights stored (in, out))."""
    k1, k2, k3, k4 = jax.random.split(key, 4)
    w1 = jax.random.normal(k1, (HIDDEN, INTERMEDIATE), jnp.float32) * INIT_RANGE
    b1 = jax.random.normal(k2, (INTERMEDIATE,), jnp.float32) * INIT_RANGE
    w2 = jax.random.normal(k3, (INTERMEDIATE, HIDDEN), jnp.float32) * INIT_RANGE
    b2 = jax.random.normal(k4, (HIDDEN,), jnp.float32) * INIT_RANGE
    return w1, b1, w2, b2


if __name__ == "__main__":
    key = jax.random.PRNGKey(0)
    k_x, k_p = jax.random.split(key)

    B, S = 2, 8  # small batch / sequence; hidden dims fixed by config
    x = jax.random.normal(k_x, (B, S, HIDDEN), jnp.float32)
    w1, b1, w2, b2 = init_params(k_p)

    # Pre-cast weights to bf16 ONCE (not per forward call).
    w1_bf = w1.astype(jnp.bfloat16)
    w2_bf = w2.astype(jnp.bfloat16)

    out = mlp_forward(x, w1_bf, b1, w2_bf, b2,
                      gelu_dtype=_default_gelu_dtype())
    out = jax.block_until_ready(out)

    # Reference in plain f32 JAX (dropout = identity in eval mode).
    # Kernel uses bf16 matmul operands with f32 accumulation -> looser tolerance.
    h_ref = x.reshape(-1, HIDDEN) @ w1 + b1
    h_ref = h_ref * jax.nn.sigmoid(1.702 * h_ref)
    ref = (h_ref @ w2 + b2).reshape(B, S, HIDDEN)
    assert jnp.allclose(out, ref, atol=2e-2, rtol=2e-2), "mismatch vs reference"

    print("KERNEL_OK")
</pallas_src>

<mosaic_0001>
module attributes {stable_mosaic.version = 11 : i64} {
  func.func @mlp_kernel(%arg0: i32, %arg1: memref<16x256xf32, #tpu.memory_space<vmem>>, %arg2: memref<256x1024xbf16, #tpu.memory_space<vmem>>, %arg3: memref<1x1024xf32, #tpu.memory_space<vmem>>, %arg4: memref<1024x256xbf16, #tpu.memory_space<vmem>>, %arg5: memref<1x256xf32, #tpu.memory_space<vmem>>, %arg6: memref<16x256xf32, #tpu.memory_space<vmem>>) attributes {dimension_semantics = [#tpu.dimension_semantics<parallel>], iteration_bounds = array<i64: 1>, scalar_prefetch = 0 : i64, scratch_operands = 0 : i64, tpu.core_type = #tpu.core_type<tc>, window_params = [{transform_indices = @transform_0, window_bounds = array<i64: 16, 256>}, {pipeline_mode = #tpu.pipeline_mode<synchronous>, transform_indices = @transform_1, window_bounds = array<i64: 256, 1024>}, {pipeline_mode = #tpu.pipeline_mode<synchronous>, transform_indices = @transform_2, window_bounds = array<i64: 1, 1024>}, {pipeline_mode = #tpu.pipeline_mode<synchronous>, transform_indices = @transform_3, window_bounds = array<i64: 1024, 256>}, {pipeline_mode = #tpu.pipeline_mode<synchronous>, transform_indices = @transform_4, window_bounds = array<i64: 1, 256>}, {transform_indices = @transform_5, window_bounds = array<i64: 16, 256>}]} {
    %c0 = arith.constant 0 : index
    %c0_0 = arith.constant 0 : index
    %0 = vector.load %arg1[%c0, %c0_0] : memref<16x256xf32, #tpu.memory_space<vmem>>, vector<16x256xf32>
    %1 = arith.truncf %0 : vector<16x256xf32> to vector<16x256xbf16>
    %c0_1 = arith.constant 0 : index
    %c0_2 = arith.constant 0 : index
    %2 = vector.load %arg2[%c0_1, %c0_2] : memref<256x1024xbf16, #tpu.memory_space<vmem>>, vector<256x1024xbf16>
    %cst = arith.constant dense<0.000000e+00> : vector<16x1024xf32>
    %3 = tpu.matmul %1, %2, %cst {dimension_numbers = #tpu.dot_dimension_numbers<[1], [0], [0], [1], [0, 0, 1, 1], [], []>} : vector<16x256xbf16>, vector<256x1024xbf16>, vector<16x1024xf32> -> vector<16x1024xf32>
    %c0_3 = arith.constant 0 : index
    %c0_4 = arith.constant 0 : index
    %4 = vector.load %arg3[%c0_3, %c0_4] : memref<1x1024xf32, #tpu.memory_space<vmem>>, vector<1x1024xf32>
    %5 = vector.broadcast %4 : vector<1x1024xf32> to vector<16x1024xf32>
    %6 = arith.addf %3, %5 : vector<16x1024xf32>
    %7 = arith.truncf %6 : vector<16x1024xf32> to vector<16x1024xbf16>
    %cst_5 = arith.constant 1.703130e+00 : bf16
    %8 = vector.broadcast %cst_5 : bf16 to vector<16x1024xbf16>
    %9 = arith.mulf %8, %7 : vector<16x1024xbf16>
    %10 = arith.negf %9 : vector<16x1024xbf16>
    %11 = math.exp %10 : vector<16x1024xbf16>
    %cst_6 = arith.constant 1.000000e+00 : bf16
    %12 = vector.broadcast %cst_6 : bf16 to vector<16x1024xbf16>
    %13 = arith.addf %12, %11 : vector<16x1024xbf16>
    %14 = arith.divf %12, %13 : vector<16x1024xbf16>
    %15 = arith.mulf %7, %14 : vector<16x1024xbf16>
    %c0_7 = arith.constant 0 : index
    %c0_8 = arith.constant 0 : index
    %16 = vector.load %arg4[%c0_7, %c0_8] : memref<1024x256xbf16, #tpu.memory_space<vmem>>, vector<1024x256xbf16>
    %cst_9 = arith.constant dense<0.000000e+00> : vector<16x256xf32>
    %17 = tpu.matmul %15, %16, %cst_9 {dimension_numbers = #tpu.dot_dimension_numbers<[1], [0], [0], [1], [0, 0, 1, 1], [], []>} : vector<16x1024xbf16>, vector<1024x256xbf16>, vector<16x256xf32> -> vector<16x256xf32>
    %c0_10 = arith.constant 0 : index
    %c0_11 = arith.constant 0 : index
    %18 = vector.load %arg5[%c0_10, %c0_11] : memref<1x256xf32, #tpu.memory_space<vmem>>, vector<1x256xf32>
    %19 = vector.broadcast %18 : vector<1x256xf32> to vector<16x256xf32>
    %20 = arith.addf %17, %19 : vector<16x256xf32>
    %c0_12 = arith.constant 0 : index
    %c0_13 = arith.constant 0 : index
    %21 = vector.load %arg6[%c0_12, %c0_13] : memref<16x256xf32, #tpu.memory_space<vmem>>, vector<16x256xf32>
    tpu.vector_store %arg6[%c0_12, %c0_13], %20 {strides = array<i32>} : memref<16x256xf32, #tpu.memory_space<vmem>>, vector<16x256xf32>,
    return
  }
  func.func @transform_0(%arg0: i32) -> (i32, i32) {
    %c0_i32 = arith.constant 0 : i32
    %c0_i32_0 = arith.constant 0 : i32
    return %arg0, %c0_i32 : i32, i32
  }
  func.func @transform_1(%arg0: i32) -> (i32, i32) {
    %c0_i32 = arith.constant 0 : i32
    %c0_i32_0 = arith.constant 0 : i32
    %c0_i32_1 = arith.constant 0 : i32
    return %c0_i32, %c0_i32_0 : i32, i32
  }
  func.func @transform_2(%arg0: i32) -> (i32, i32) {
    %c0_i32 = arith.constant 0 : i32
    %c0_i32_0 = arith.constant 0 : i32
    %c0_i32_1 = arith.constant 0 : i32
    return %c0_i32, %c0_i32_0 : i32, i32
  }
  func.func @transform_3(%arg0: i32) -> (i32, i32) {
    %c0_i32 = arith.constant 0 : i32
    %c0_i32_0 = arith.constant 0 : i32
    %c0_i32_1 = arith.constant 0 : i32
    return %c0_i32, %c0_i32_0 : i32, i32
  }
  func.func @transform_4(%arg0: i32) -> (i32, i32) {
    %c0_i32 = arith.constant 0 : i32
    %c0_i32_0 = arith.constant 0 : i32
    %c0_i32_1 = arith.constant 0 : i32
    return %c0_i32, %c0_i32_0 : i32, i32
  }
  func.func @transform_5(%arg0: i32) -> (i32, i32) {
    %c0_i32 = arith.constant 0 : i32
    %c0_i32_0 = arith.constant 0 : i32
    return %arg0, %c0_i32 : i32, i32
  }
}

</mosaic_0001>

<bundles_post_ra>
// kernel: mlp_forward.1
= control target key start
LH: loop header
LB: loop body
LE: loop exit
PB: predicated region body
PF: predicated region fallthrough
CT: control target
= control target key end

     0   :  { %10 = vsyncpa [#allocation3], 0  ;;  %s4128_s0 = inlined_call_operand.hbm [shape: f32[16,256], index: 0, kind: input, shape index: {}]   ;;  %s4129_s1 = inlined_call_operand.hbm [shape: bf16[256,1024], index: 1, kind: input, shape index: {}]   ;;  %s4130_s2 = inlined_call_operand.hbm [shape: f32[1,1024], index: 2, kind: input, shape index: {}]   ;;  %s4131_s3 = inlined_call_operand.hbm [shape: bf16[1024,256], index: 3, kind: input, shape index: {}]   ;;  %s4132_s4 = inlined_call_operand.vmem [shape: f32[1,256], index: 4, kind: input, shape index: {}]   ;;  %s4133_s5 = inlined_call_operand.hbm [shape: f32[16,256], index: 5, kind: output, shape index: {}]  }
   0x1   :  { %11 = vsyncpa [#allocation6], 0 }
   0x2   :  { %12 = vsyncpa [#allocation9], 0  ;;  %s31_s20 = sshll.u32 %s4129_s1, 4  ;;  %s32_s20 = int_to_ptr.hbm [resolvable:$true] %s31_s20 }
   0x3   :  { %13 = vsyncpa [#allocation4], 0  ;;  %s3856_s21 = smov [#allocation5]   ;;  %s18_s25 = sshll.u32 %s4128_s0, 4  ;;  %s19_s25 = int_to_ptr.hbm [resolvable:$true] %s18_s25 }
   0x4   :  { %s33_s22 = sshll.u32 %s3856_s21, 4  ;;  %s3857_s26 = smov 512   ;;  %s34_s22 = int_to_ptr.vmem [resolvable:$true] %s33_s22 }
   0x5   :  { %s3858_s27 = smov 32   ;;  %s3859_s28 = smov [#allocation2]  }
   0x6   :  { %39 = dma.hbm_to_vmem [thread:$0]  %s32_s20, 16384, %s34_s22, [#allocation6], %s3857_s26, %s3857_s26, %s3858_s27  }
   0x7   :  { %s20_s29 = sshll.u32 %s3859_s28, 4  ;;  %s3860_s30 = smov 256   ;;  %s21_s29 = int_to_ptr.vmem [resolvable:$true] %s20_s29 }
   0x8   :  { %s3861_s6 = smov 16   ;;  %s45_s8 = sshll.u32 %s4130_s2, 4  ;;  %s46_s8 = int_to_ptr.hbm [resolvable:$true] %s45_s8 }
   0x9   :  { %26 = dma.hbm_to_vmem [thread:$0]  %s19_s25, 512, %s21_s29, [#allocation3], %s3860_s30, %s3860_s30, %s3861_s6  }
   0xa   :  { %s3862_s9 = smov [#allocation7]   ;;  %s55_s12 = sshll.u32 %s4131_s3, 4  ;;  %s56_s12 = int_to_ptr.hbm [resolvable:$true] %s55_s12 }
   0xb   :  { %s47_s0 = sshll.u32 %s3862_s9, 4  ;;  %s3863_s13 = smov [#allocation8]   ;;  %s48_s0 = int_to_ptr.vmem [resolvable:$true] %s47_s0 }
   0xc   :  { %50 = dma.hbm_to_vmem [thread:$0]  %s46_s8, 128, %s48_s0, [#allocation6]  }
   0xd   :  { %s57_s14 = sshll.u32 %s3863_s13, 4  ;;  %s3864_s15 = smov 128   ;;  %s58_s14 = int_to_ptr.vmem [resolvable:$true] %s57_s14 }
   0xe   :  { %s3865_s16 = smov 8  }
   0xf   :  { %63 = dma.hbm_to_vmem [thread:$0]  %s56_s12, 16384, %s58_s14, [#allocation9], %s3864_s15, %s3864_s15, %s3865_s16  }
  0x10   :  { %3848 = dma.done.wait [#allocation3], 512  }
  0x11   :  { %3849 = vsyncadd [#allocation3], 4294966784 }
  0x12   :  { %3850 = dma.done.wait [#allocation6], 16512  }
  0x13   :  { %3851 = vsyncadd [#allocation6], 4294950784 }
  0x14   :  { %3852 = dma.done.wait [#allocation9], 16384  }
  0x15   :  { %3853 = vsyncadd [#allocation9], 4294950912  ;;  %v2598_v0 = vld [vmem:[#allocation5 + $0x1c0] sm:$0xf]  ;;  %v3452_v5 = vld [vmem:[#allocation5 + $0x1c4] sm:$0xf] }
  0x16   :  { %v3456_v1 = vld [vmem:[#allocation5 + $0x1dc] sm:$0xf0]  ;;  %v2600_v6 = vld [vmem:[#allocation5 + $0x1e0] sm:$0xf0]  ;;  %s2357_s20 = sshll.u32 %s4133_s5, 4  ;;  %s2358_s20 = int_to_ptr.hbm [resolvable:$true] %s2357_s20 }
  0x17   :  { %v2854_v2 = vld [vmem:[#allocation5 + $0x3c0] sm:$0xf]  ;;  %v2599_v3 = vor.u32 %v3456_v1, %v2598_v0  ;;  %v2603_v8 = vor.u32 %v3452_v5, %v2600_v6  ;;  %v3516_v9 = vld [vmem:[#allocation5 + $0x3c4] sm:$0xf] }
  0x18   :  { %v3520_v4 = vld [vmem:[#allocation5 + $0x3dc] sm:$0xf0]  ;;  %v2856_v10 = vld [vmem:[#allocation5 + $0x3e0] sm:$0xf0] }
  0x19   :  { %v2855_v7 = vor.u32 %v3520_v4, %v2854_v2  ;;  %v2566_v11 = vld [vmem:[#allocation5 + $0x180] sm:$0xf]  ;;  %875 = vmatpush.bf16.msra.mxu0 %v2599_v3  ;;  %v2859_v12 = vor.u32 %v3516_v9, %v2856_v10  ;;  %903 = vmatpush.bf16.msra.mxu2 %v2603_v8  ;;  %v3444_v18 = vld [vmem:[#allocation5 + $0x184] sm:$0xf] }
  0x1a   :  { %v3448_v13 = vld [vmem:[#allocation5 + $0x19c] sm:$0xf0]  ;;  %v2568_v19 = vld [vmem:[#allocation5 + $0x1a0] sm:$0xf0] }
  0x1b   :  { %v2822_v14 = vld [vmem:[#allocation5 + $0x380] sm:$0xf]  ;;  %889 = vmatpush.bf16.msra.mxu1 %v2855_v7  ;;  %v2567_v16 = vor.u32 %v3448_v13, %v2566_v11  ;;  %v3508_v20 = vld [vmem:[#allocation5 + $0x384] sm:$0xf]  ;;  %917 = vmatpush.bf16.msra.mxu3 %v2859_v12  ;;  %v2571_v21 = vor.u32 %v3444_v18, %v2568_v19 }
  0x1c   :  { %v3512_v15 = vld [vmem:[#allocation5 + $0x39c] sm:$0xf0]  ;;  %v2824_v22 = vld [vmem:[#allocation5 + $0x3a0] sm:$0xf0] }
  0x1d   :  { %v2823_v17 = vor.u32 %v3512_v15, %v2822_v14  ;;  %v2534_v23 = vld [vmem:[#allocation5 + $0x140] sm:$0xf]  ;;  %v2827_v25 = vor.u32 %v3508_v20, %v2824_v22  ;;  %v3436_v28 = vld [vmem:[#allocation5 + $0x144] sm:$0xf]  ;;  %876 = vmatpush.bf16.msra.mxu0 %v2567_v16  ;;  %904 = vmatpush.bf16.msra.mxu2 %v2571_v21 }
  0x1e   :  { %v3440_v24 = vld [vmem:[#allocation5 + $0x15c] sm:$0xf0]  ;;  %v2536_v30 = vld [vmem:[#allocation5 + $0x160] sm:$0xf0] }
  0x1f   :  { %v2790_v26 = vld [vmem:[#allocation5 + $0x340] sm:$0xf]  ;;  %v2535_v29 = vor.u32 %v3440_v24, %v2534_v23  ;;  %v3500_v31 = vld [vmem:[#allocation5 + $0x344] sm:$0xf]  ;;  %890 = vmatpush.bf16.msra.mxu1 %v2823_v17  ;;  %v2539_v34 = vor.u32 %v3436_v28, %v2536_v30  ;;  %918 = vmatpush.bf16.msra.mxu3 %v2827_v25  ;;  %v2606_v28 = vld [vmem:[#allocation5 + $0x1c8] sm:$0xf] }
  0x20   :  { %v3504_v27 = vld [vmem:[#allocation5 + $0x35c] sm:$0xf0]  ;;  %v2792_v32 = vld [vmem:[#allocation5 + $0x360] sm:$0xf0]  ;;  %v2862_v30 = vld [vmem:[#allocation5 + $0x3c8] sm:$0xf] }
  0x21   :  { %v2791_v33 = vor.u32 %v3504_v27, %v2790_v26  ;;  %v2502_v35 = vld [vmem:[#allocation5 + $0x100] sm:$0xf]  ;;  %v2795_v38 = vor.u32 %v3500_v31, %v2792_v32  ;;  %v3428_v40 = vld [vmem:[#allocation5 + $0x104] sm:$0xf]  ;;  %877 = vmatpush.bf16.msra.mxu0 %v2535_v29  ;;  %905 = vmatpush.bf16.msra.mxu2 %v2539_v34  ;;  %v3457_v29 = vld [vmem:[#allocation5 + $0x1e4] sm:$0xf0] }
  0x22   :  { %v3432_v36 = vld [vmem:[#allocation5 + $0x11c] sm:$0xf0]  ;;  %v2504_v41 = vld [vmem:[#allocation5 + $0x120] sm:$0xf0]  ;;  %v3521_v31 = vld [vmem:[#allocation5 + $0x3e4] sm:$0xf0] }
  0x23   :  { %v2758_v37 = vld [vmem:[#allocation5 + $0x300] sm:$0xf]  ;;  %v3492_v42 = vld [vmem:[#allocation5 + $0x304] sm:$0xf]  ;;  %v2503_v44 = vor.u32 %v3432_v36, %v2502_v35  ;;  %891 = vmatpush.bf16.msra.mxu1 %v2791_v33  ;;  %v2507_v46 = vor.u32 %v3428_v40, %v2504_v41  ;;  %919 = vmatpush.bf16.msra.mxu3 %v2795_v38  ;;  %v3453_v33 = vld [vmem:[#allocation5 + $0x1cc] sm:$0xf] }
  0x24   :  { %v3496_v39 = vld [vmem:[#allocation5 + $0x31c] sm:$0xf0]  ;;  %v2760_v43 = vld [vmem:[#allocation5 + $0x320] sm:$0xf0]  ;;  %v2608_v34 = vld [vmem:[#allocation5 + $0x1e8] sm:$0xf0] }
  0x25   :  { %v2759_v45 = vor.u32 %v3496_v39, %v2758_v37  ;;  %v2470_v47 = vld [vmem:[#allocation5 + $0xc0] sm:$0xf]  ;;  %v2763_v50 = vor.u32 %v3492_v42, %v2760_v43  ;;  %v3420_v52 = vld [vmem:[#allocation5 + $0xc4] sm:$0xf]  ;;  %878 = vmatpush.bf16.msra.mxu0 %v2503_v44  ;;  %906 = vmatpush.bf16.msra.mxu2 %v2507_v46  ;;  %v3517_v35 = vld [vmem:[#allocation5 + $0x3cc] sm:$0xf]  ;;  %v2607_v42 = vor.u32 %v3457_v29, %v2606_v28 }
  0x26   :  { %v3424_v48 = vld [vmem:[#allocation5 + $0xdc] sm:$0xf0]  ;;  %v2472_v53 = vld [vmem:[#allocation5 + $0xe0] sm:$0xf0]  ;;  %v2864_v38 = vld [vmem:[#allocation5 + $0x3e8] sm:$0xf0]  ;;  %v2611_v46 = vor.u32 %v3453_v33, %v2608_v34 }
  0x27   :  { %v2726_v49 = vld [vmem:[#allocation5 + $0x2c0] sm:$0xf]  ;;  %v3484_v54 = vld [vmem:[#allocation5 + $0x2c4] sm:$0xf]  ;;  %v2471_v56 = vor.u32 %v3424_v48, %v2470_v47  ;;  %892 = vmatpush.bf16.msra.mxu1 %v2759_v45  ;;  %v2475_v58 = vor.u32 %v3420_v52, %v2472_v53  ;;  %920 = vmatpush.bf16.msra.mxu3 %v2763_v50  ;;  %v85_v40 = vld [vmem:[#allocation2 + $0x10] sm:$0xff]  ;;  %v2863_v45 = vor.u32 %v3521_v31, %v2862_v30 }
  0x28   :  { %v3488_v51 = vld [vmem:[#allocation5 + $0x2dc] sm:$0xf0]  ;;  %v2728_v55 = vld [vmem:[#allocation5 + $0x2e0] sm:$0xf0]  ;;  %v84_v43 = vld [vmem:[#allocation2 + $0x8] sm:$0xff]  ;;  %v2867_v50 = vor.u32 %v3517_v35, %v2864_v38 }
  0x29   :  { %v2727_v57 = vor.u32 %v3488_v51, %v2726_v49  ;;  %v2438_v59 = vld [vmem:[#allocation5 + $0x80] sm:$0xf]  ;;  %v2731_v62 = vor.u32 %v3484_v54, %v2728_v55  ;;  %v3412_v0 = vld [vmem:[#allocation5 + $0x84] sm:$0xf]  ;;  %879 = vmatpush.bf16.msra.mxu0 %v2471_v56  ;;  %907 = vmatpush.bf16.msra.mxu2 %v2475_v58  ;;  %v86_v44 = vld [vmem:[#allocation2 + $0x18] sm:$0xff] }
  0x2a   :  { %v3416_v60 = vld [vmem:[#allocation5 + $0x9c] sm:$0xf0]  ;;  %v2440_v1 = vld [vmem:[#allocation5 + $0xa0] sm:$0xf0]  ;;  %v2574_v47 = vld [vmem:[#allocation5 + $0x188] sm:$0xf]  ;;  %v3915_v55 = vpack.c.bf16 %v86_v44, %v84_v43 }
  0x2b   :  { %v2694_v61 = vld [vmem:[#allocation5 + $0x280] sm:$0xf]  ;;  %v3476_v2 = vld [vmem:[#allocation5 + $0x284] sm:$0xf]  ;;  %v2439_v4 = vor.u32 %v3416_v60, %v2438_v59  ;;  %893 = vmatpush.bf16.msra.mxu1 %v2727_v57  ;;  %v2443_v6 = vor.u32 %v3412_v0, %v2440_v1  ;;  %921 = vmatpush.bf16.msra.mxu3 %v2731_v62  ;;  %v3449_v48 = vld [vmem:[#allocation5 + $0x1a4] sm:$0xf0] }
  0x2c   :  { %v3480_v63 = vld [vmem:[#allocation5 + $0x29c] sm:$0xf0]  ;;  %v2696_v3 = vld [vmem:[#allocation5 + $0x2a0] sm:$0xf0]  ;;  %v2830_v49 = vld [vmem:[#allocation5 + $0x388] sm:$0xf]  ;;  %v2575_v58 = vor.u32 %v3449_v48, %v2574_v47 }
  0x2d   :  { %v2695_v5 = vor.u32 %v3480_v63, %v2694_v61  ;;  %v2406_v7 = vld [vmem:[#allocation5 + $0x40] sm:$0xf]  ;;  %v2699_v10 = vor.u32 %v3476_v2, %v2696_v3  ;;  %v3404_v12 = vld [vmem:[#allocation5 + $0x44] sm:$0xf]  ;;  %880 = vmatpush.bf16.msra.mxu0 %v2439_v4  ;;  %908 = vmatpush.bf16.msra.mxu2 %v2443_v6  ;;  %v3513_v52 = vld [vmem:[#allocation5 + $0x3a4] sm:$0xf0] }
  0x2e   :  { %v3408_v8 = vld [vmem:[#allocation5 + $0x5c] sm:$0xf0]  ;;  %v2408_v13 = vld [vmem:[#allocation5 + $0x60] sm:$0xf0]  ;;  %v3445_v53 = vld [vmem:[#allocation5 + $0x18c] sm:$0xf]  ;;  %v2831_v59 = vor.u32 %v3513_v52, %v2830_v49 }
  0x2f   :  { %v2662_v9 = vld [vmem:[#allocation5 + $0x240] sm:$0xf]  ;;  %v3468_v14 = vld [vmem:[#allocation5 + $0x244] sm:$0xf]  ;;  %v2407_v16 = vor.u32 %v3408_v8, %v2406_v7  ;;  %894 = vmatpush.bf16.msra.mxu1 %v2695_v5  ;;  %v2411_v21 = vor.u32 %v3404_v12, %v2408_v13  ;;  %922 = vmatpush.bf16.msra.mxu3 %v2699_v10  ;;  %v2576_v54 = vld [vmem:[#allocation5 + $0x1a8] sm:$0xf0] }
  0x30   :  { %v3472_v11 = vld [vmem:[#allocation5 + $0x25c] sm:$0xf0]  ;;  %v2664_v15 = vld [vmem:[#allocation5 + $0x260] sm:$0xf0]  ;;  %v3509_v56 = vld [vmem:[#allocation5 + $0x38c] sm:$0xf]  ;;  %v2579_v60 = vor.u32 %v3445_v53, %v2576_v54 }
  0x31   :  { %v2374_v17 = vld [vmem:[#allocation5] sm:$0xf]  ;;  %v2663_v20 = vor.u32 %v3472_v11, %v2662_v9  ;;  %v3396_v23 = vld [vmem:[#allocation5 + $0x4] sm:$0xf]  ;;  %v2667_v25 = vor.u32 %v3468_v14, %v2664_v15  ;;  %881 = vmatpush.bf16.msra.mxu0 %v2407_v16  ;;  %909 = vmatpush.bf16.msra.mxu2 %v2411_v21  ;;  %v2832_v57 = vld [vmem:[#allocation5 + $0x3a8] sm:$0xf0] }
  0x32   :  { %v3400_v18 = vld [vmem:[#allocation5 + $0x1c] sm:$0xf0]  ;;  %v2376_v24 = vld [vmem:[#allocation5 + $0x20] sm:$0xf0]  ;;  %v2542_v61 = vld [vmem:[#allocation5 + $0x148] sm:$0xf]  ;;  %v2835_v0 = vor.u32 %v3509_v56, %v2832_v57 }
  0x33   :  { %v2630_v19 = vld [vmem:[#allocation5 + $0x200] sm:$0xf]  ;;  %v3460_v26 = vld [vmem:[#allocation5 + $0x204] sm:$0xf]  ;;  %v2375_v32 = vor.u32 %v3400_v18, %v2374_v17  ;;  %895 = vmatpush.bf16.msra.mxu1 %v2663_v20  ;;  %v2379_v37 = vor.u32 %v3396_v23, %v2376_v24  ;;  %923 = vmatpush.bf16.msra.mxu3 %v2667_v25  ;;  %v3441_v62 = vld [vmem:[#allocation5 + $0x164] sm:$0xf0] }
  0x34   :  { %v3464_v22 = vld [vmem:[#allocation5 + $0x21c] sm:$0xf0]  ;;  %v2632_v27 = vld [vmem:[#allocation5 + $0x220] sm:$0xf0]  ;;  %v2798_v63 = vld [vmem:[#allocation5 + $0x348] sm:$0xf]  ;;  %v2543_v6 = vor.u32 %v3441_v62, %v2542_v61 }
  0x35   :  { %v2631_v36 = vor.u32 %v3464_v22, %v2630_v19  ;;  %v83_v39 = vld [vmem:[#allocation2] sm:$0xff]  ;;  %v2635_v41 = vor.u32 %v3460_v26, %v2632_v27  ;;  %882 = vmatpush.bf16.msra.mxu0 %v2375_v32  ;;  %910 = vmatpush.bf16.msra.mxu2 %v2379_v37  ;;  %v3505_v1 = vld [vmem:[#allocation5 + $0x364] sm:$0xf0]  ;;  %v3437_v2 = vld [vmem:[#allocation5 + $0x14c] sm:$0xf] }
  0x36   :  { %v3913_v51 = vpack.c.bf16 %v85_v40, %v83_v39  ;;  %v2544_v3 = vld [vmem:[#allocation5 + $0x168] sm:$0xf0]  ;;  %v2799_v7 = vor.u32 %v3505_v1, %v2798_v63  ;;  %v2510_v9 = vld [vmem:[#allocation5 + $0x108] sm:$0xf] }
  0x37   :  { %896 = vmatpush.bf16.msra.mxu1 %v2631_v36  ;;  %924 = vmatpush.bf16.msra.mxu3 %v2635_v41  ;;  %v3501_v4 = vld [vmem:[#allocation5 + $0x34c] sm:$0xf]  ;;  %v2547_v8 = vor.u32 %v3437_v2, %v2544_v3  ;;  %v3433_v10 = vld [vmem:[#allocation5 + $0x124] sm:$0xf0] }
  0x38   :  { %911 = vmatmul.bf16.vlgmr.msra.gmra.mxu2 %v3913_v51  ;;  %883 = vmatmul.bf16.vlgmr.msra.gmra.mxu0 %v3913_v51  ;;  %v2800_v5 = vld [vmem:[#allocation5 + $0x368] sm:$0xf0]  ;;  %v2766_v11 = vld [vmem:[#allocation5 + $0x308] sm:$0xf]  ;;  %v2511_v18 = vor.u32 %v3433_v10, %v2510_v9  ;;  %v3454_v9 = vld [vmem:[#allocation5 + $0x1d4] sm:$0xf] }
  0x39   :  { %931 = vmatpush.bf16.msrb.mxu0 %v2607_v42  ;;  %959 = vmatpush.bf16.msrb.mxu2 %v2611_v46  ;;  %v2803_v12 = vor.u32 %v3501_v4, %v2800_v5  ;;  %v3497_v13 = vld [vmem:[#allocation5 + $0x324] sm:$0xf0]  ;;  %v3429_v14 = vld [vmem:[#allocation5 + $0x10c] sm:$0xf]  ;;  %v2614_v4 = vld [vmem:[#allocation5 + $0x1d0] sm:$0xf] }
  0x3a   :  { %925 = vmatmul.bf16.vlgmr.msra.gmra.mxu3 %v3915_v55  ;;  %897 = vmatmul.bf16.vlgmr.msra.gmra.mxu1 %v3915_v55  ;;  %v2512_v15 = vld [vmem:[#allocation5 + $0x128] sm:$0xf0]  ;;  %v2767_v19 = vor.u32 %v3497_v13, %v2766_v11  ;;  %v2478_v21 = vld [vmem:[#allocation5 + $0xc8] sm:$0xf]  ;;  %v3458_v5 = vld [vmem:[#allocation5 + $0x1ec] sm:$0xf0] }
  0x3b   :  { %945 = vmatpush.bf16.msrb.mxu1 %v2863_v45  ;;  %973 = vmatpush.bf16.msrb.mxu3 %v2867_v50  ;;  %v3493_v16 = vld [vmem:[#allocation5 + $0x30c] sm:$0xf]  ;;  %v2515_v20 = vor.u32 %v3429_v14, %v2512_v15  ;;  %v3425_v22 = vld [vmem:[#allocation5 + $0xe4] sm:$0xf0]  ;;  %v2616_v10 = vld [vmem:[#allocation5 + $0x1f0] sm:$0xf0] }
  0x3c   :  { %v2768_v17 = vld [vmem:[#allocation5 + $0x328] sm:$0xf0]  ;;  %v2734_v23 = vld [vmem:[#allocation5 + $0x2c8] sm:$0xf]  ;;  %v2479_v30 = vor.u32 %v3425_v22, %v2478_v21  ;;  %v3518_v13 = vld [vmem:[#allocation5 + $0x3d4] sm:$0xf] }
  0x3d   :  { %932 = vmatpush.bf16.msrb.mxu0 %v2575_v58  ;;  %960 = vmatpush.bf16.msrb.mxu2 %v2579_v60  ;;  %v2771_v24 = vor.u32 %v3493_v16, %v2768_v17  ;;  %v3489_v25 = vld [vmem:[#allocation5 + $0x2e4] sm:$0xf0]  ;;  %v3421_v26 = vld [vmem:[#allocation5 + $0xcc] sm:$0xf]  ;;  %v2872_v14 = vld [vmem:[#allocation5 + $0x3f0] sm:$0xf0]  ;;  %v2615_v16 = vor.u32 %v3458_v5, %v2614_v4 }
  0x3e   :  { %v2480_v27 = vld [vmem:[#allocation5 + $0xe8] sm:$0xf0]  ;;  %v2735_v31 = vor.u32 %v3489_v25, %v2734_v23  ;;  %v2446_v33 = vld [vmem:[#allocation5 + $0x88] sm:$0xf]  ;;  %v2838_v21 = vld [vmem:[#allocation5 + $0x390] sm:$0xf]  ;;  %v2875_v22 = vor.u32 %v3518_v13, %v2872_v14 }
  0x3f   :  { %946 = vmatpush.bf16.msrb.mxu1 %v2831_v59  ;;  %974 = vmatpush.bf16.msrb.mxu3 %v2835_v0  ;;  %v3485_v28 = vld [vmem:[#allocation5 + $0x2cc] sm:$0xf]  ;;  %v2483_v32 = vor.u32 %v3421_v26, %v2480_v27  ;;  %v3417_v34 = vld [vmem:[#allocation5 + $0xa4] sm:$0xf0]  ;;  %v3514_v23 = vld [vmem:[#allocation5 + $0x3ac] sm:$0xf0] }
  0x40   :  { %v2736_v29 = vld [vmem:[#allocation5 + $0x2e8] sm:$0xf0]  ;;  %v2702_v35 = vld [vmem:[#allocation5 + $0x288] sm:$0xf]  ;;  %v2447_v42 = vor.u32 %v3417_v34, %v2446_v33  ;;  %v2584_v25 = vld [vmem:[#allocation5 + $0x1b0] sm:$0xf0] }
  0x41   :  { %933 = vmatpush.bf16.msrb.mxu0 %v2543_v6  ;;  %961 = vmatpush.bf16.msrb.mxu2 %v2547_v8  ;;  %v2739_v36 = vor.u32 %v3485_v28, %v2736_v29  ;;  %v3481_v37 = vld [vmem:[#allocation5 + $0x2a4] sm:$0xf0]  ;;  %v3413_v38 = vld [vmem:[#allocation5 + $0x8c] sm:$0xf]  ;;  %v2870_v6 = vld [vmem:[#allocation5 + $0x3d0] sm:$0xf]  ;;  %v2839_v29 = vor.u32 %v3514_v23, %v2838_v21 }
  0x42   :  { %v2448_v39 = vld [vmem:[#allocation5 + $0xa8] sm:$0xf0]  ;;  %v2703_v43 = vor.u32 %v3481_v37, %v2702_v35  ;;  %v2414_v45 = vld [vmem:[#allocation5 + $0x48] sm:$0xf]  ;;  %v3522_v8 = vld [vmem:[#allocation5 + $0x3ec] sm:$0xf0] }
  0x43   :  { %947 = vmatpush.bf16.msrb.mxu1 %v2799_v7  ;;  %975 = vmatpush.bf16.msrb.mxu3 %v2803_v12  ;;  %v3477_v40 = vld [vmem:[#allocation5 + $0x28c] sm:$0xf]  ;;  %v2451_v44 = vor.u32 %v3413_v38, %v2448_v39  ;;  %v3409_v46 = vld [vmem:[#allocation5 + $0x64] sm:$0xf0]  ;;  %v2871_v17 = vor.u32 %v3522_v8, %v2870_v6  ;;  %v3510_v26 = vld [vmem:[#allocation5 + $0x394] sm:$0xf] }
  0x44   :  { %v2704_v41 = vld [vmem:[#allocation5 + $0x2a8] sm:$0xf0]  ;;  %v2670_v47 = vld [vmem:[#allocation5 + $0x248] sm:$0xf]  ;;  %v2415_v56 = vor.u32 %v3409_v46, %v2414_v45  ;;  %v2840_v27 = vld [vmem:[#allocation5 + $0x3b0] sm:$0xf0] }
  0x45   :  { %934 = vmatpush.bf16.msrb.mxu0 %v2511_v18  ;;  %962 = vmatpush.bf16.msrb.mxu2 %v2515_v20  ;;  %v2707_v48 = vor.u32 %v3477_v40, %v2704_v41  ;;  %v3473_v49 = vld [vmem:[#allocation5 + $0x264] sm:$0xf0]  ;;  %v3405_v50 = vld [vmem:[#allocation5 + $0x4c] sm:$0xf]  ;;  %v2619_v18 = vor.u32 %v3454_v9, %v2616_v10  ;;  %v3450_v20 = vld [vmem:[#allocation5 + $0x1ac] sm:$0xf0]  ;;  %v2843_v34 = vor.u32 %v3510_v26, %v2840_v27 }
  0x46   :  { %v2416_v52 = vld [vmem:[#allocation5 + $0x68] sm:$0xf0]  ;;  %v2382_v57 = vld [vmem:[#allocation5 + $0x8] sm:$0xf]  ;;  %v2671_v59 = vor.u32 %v3473_v49, %v2670_v47  ;;  %v2806_v33 = vld [vmem:[#allocation5 + $0x350] sm:$0xf] }
  0x47   :  { %948 = vmatpush.bf16.msrb.mxu1 %v2767_v19  ;;  %976 = vmatpush.bf16.msrb.mxu3 %v2771_v24  ;;  %v3469_v53 = vld [vmem:[#allocation5 + $0x24c] sm:$0xf]  ;;  %v3401_v58 = vld [vmem:[#allocation5 + $0x24] sm:$0xf0]  ;;  %v2419_v60 = vor.u32 %v3405_v50, %v2416_v52  ;;  %v2582_v19 = vld [vmem:[#allocation5 + $0x190] sm:$0xf] }
  0x48   :  { %v2672_v54 = vld [vmem:[#allocation5 + $0x268] sm:$0xf0]  ;;  %v2638_v61 = vld [vmem:[#allocation5 + $0x208] sm:$0xf]  ;;  %v2383_v7 = vor.u32 %v3401_v58, %v2382_v57  ;;  %v3446_v24 = vld [vmem:[#allocation5 + $0x194] sm:$0xf]  ;;  %v2583_v28 = vor.u32 %v3450_v20, %v2582_v19 }
  0x49   :  { %935 = vmatpush.bf16.msrb.mxu0 %v2479_v30  ;;  %963 = vmatpush.bf16.msrb.mxu2 %v2483_v32  ;;  %v3465_v62 = vld [vmem:[#allocation5 + $0x224] sm:$0xf0]  ;;  %v3397_v63 = vld [vmem:[#allocation5 + $0xc] sm:$0xf]  ;;  %v2675_v0 = vor.u32 %v3469_v53, %v2672_v54  ;;  %v2587_v30 = vor.u32 %v3446_v24, %v2584_v25  ;;  %v3442_v32 = vld [vmem:[#allocation5 + $0x16c] sm:$0xf0] }
  0x4a   :  { %v2384_v1 = vld [vmem:[#allocation5 + $0x28] sm:$0xf0]  ;;  %v2639_v11 = vor.u32 %v3465_v62, %v2638_v61  ;;  %v3506_v35 = vld [vmem:[#allocation5 + $0x36c] sm:$0xf0]  ;;  %v2552_v37 = vld [vmem:[#allocation5 + $0x170] sm:$0xf0] }
  0x4b   :  { %949 = vmatpush.bf16.msrb.mxu1 %v2735_v31  ;;  %977 = vmatpush.bf16.msrb.mxu3 %v2739_v36  ;;  %v3461_v2 = vld [vmem:[#allocation5 + $0x20c] sm:$0xf]  ;;  %v2387_v12 = vor.u32 %v3397_v63, %v2384_v1  ;;  %v2550_v31 = vld [vmem:[#allocation5 + $0x150] sm:$0xf]  ;;  %v3438_v36 = vld [vmem:[#allocation5 + $0x154] sm:$0xf]  ;;  %v2807_v41 = vor.u32 %v3506_v35, %v2806_v33 }
  0x4c   :  { %v2640_v3 = vld [vmem:[#allocation5 + $0x228] sm:$0xf0]  ;;  %v3502_v38 = vld [vmem:[#allocation5 + $0x354] sm:$0xf]  ;;  %v2551_v40 = vor.u32 %v3442_v32, %v2550_v31  ;;  %v2774_v45 = vld [vmem:[#allocation5 + $0x310] sm:$0xf] }
  0x4d   :  { %936 = vmatpush.bf16.msrb.mxu0 %v2447_v42  ;;  %964 = vmatpush.bf16.msrb.mxu2 %v2451_v44  ;;  %v2643_v15 = vor.u32 %v3461_v2, %v2640_v3  ;;  %v2808_v39 = vld [vmem:[#allocation5 + $0x370] sm:$0xf0]  ;;  %v2555_v42 = vor.u32 %v3438_v36, %v2552_v37  ;;  %v3434_v44 = vld [vmem:[#allocation5 + $0x12c] sm:$0xf0] }
  0x4e   :  { %v2811_v46 = vor.u32 %v3502_v38, %v2808_v39  ;;  %v3498_v47 = vld [vmem:[#allocation5 + $0x32c] sm:$0xf0]  ;;  %v2520_v49 = vld [vmem:[#allocation5 + $0x130] sm:$0xf0]  ;;  %v2622_v38 = vld [vmem:[#allocation5 + $0x1d8] sm:$0xf] }
  0x4f   :  { %950 = vmatpush.bf16.msrb.mxu1 %v2703_v43  ;;  %978 = vmatpush.bf16.msrb.mxu3 %v2707_v48  ;;  %v2518_v43 = vld [vmem:[#allocation5 + $0x110] sm:$0xf]  ;;  %v3430_v48 = vld [vmem:[#allocation5 + $0x114] sm:$0xf]  ;;  %v2775_v54 = vor.u32 %v3498_v47, %v2774_v45  ;;  %v3459_v39 = vld [vmem:[#allocation5 + $0x1f4] sm:$0xf0] }
  0x50   :  { %v3494_v50 = vld [vmem:[#allocation5 + $0x314] sm:$0xf]  ;;  %v2519_v53 = vor.u32 %v3434_v44, %v2518_v43  ;;  %v2486_v57 = vld [vmem:[#allocation5 + $0xd0] sm:$0xf]  ;;  %v3455_v43 = vld [vmem:[#allocation5 + $0x1dc] sm:$0xf] }
  0x51   :  { %937 = vmatpush.bf16.msrb.mxu0 %v2415_v56  ;;  %965 = vmatpush.bf16.msrb.mxu2 %v2419_v60  ;;  %v2776_v52 = vld [vmem:[#allocation5 + $0x330] sm:$0xf0]  ;;  %v2523_v56 = vor.u32 %v3430_v48, %v2520_v49  ;;  %v3426_v58 = vld [vmem:[#allocation5 + $0xec] sm:$0xf0]  ;;  %v2624_v44 = vld [vmem:[#allocation5 + $0x1f8] sm:$0xf0] }
  0x52   :  { %v2779_v60 = vor.u32 %v3494_v50, %v2776_v52  ;;  %v3490_v61 = vld [vmem:[#allocation5 + $0x2ec] sm:$0xf0]  ;;  %v3422_v62 = vld [vmem:[#allocation5 + $0xd4] sm:$0xf]  ;;  %v2487_v2 = vor.u32 %v3426_v58, %v2486_v57  ;;  %v3519_v47 = vld [vmem:[#allocation5 + $0x3dc] sm:$0xf]  ;;  %v2623_v50 = vor.u32 %v3459_v39, %v2622_v38 }
  0x53   :  { %951 = vmatpush.bf16.msrb.mxu1 %v2671_v59  ;;  %979 = vmatpush.bf16.msrb.mxu3 %v2675_v0  ;;  %v2742_v59 = vld [vmem:[#allocation5 + $0x2d0] sm:$0xf]  ;;  %v2488_v63 = vld [vmem:[#allocation5 + $0xf0] sm:$0xf0]  ;;  %v2880_v48 = vld [vmem:[#allocation5 + $0x3f8] sm:$0xf0] }
  0x54   :  { %v3486_v0 = vld [vmem:[#allocation5 + $0x2d4] sm:$0xf]  ;;  %v2743_v3 = vor.u32 %v3490_v61, %v2742_v59  ;;  %v2491_v4 = vor.u32 %v3422_v62, %v2488_v63  ;;  %v2454_v5 = vld [vmem:[#allocation5 + $0x90] sm:$0xf]  ;;  %v2846_v57 = vld [vmem:[#allocation5 + $0x398] sm:$0xf]  ;;  %v2883_v58 = vor.u32 %v3519_v47, %v2880_v48 }
  0x55   :  { %938 = vmatpush.bf16.msrb.mxu0 %v2383_v7  ;;  %966 = vmatpush.bf16.msrb.mxu2 %v2387_v12  ;;  %v2744_v1 = vld [vmem:[#allocation5 + $0x2f0] sm:$0xf0]  ;;  %v3418_v6 = vld [vmem:[#allocation5 + $0xac] sm:$0xf0]  ;;  %v3515_v59 = vld [vmem:[#allocation5 + $0x3b4] sm:$0xf0] }
  0x56   :  { %v2710_v7 = vld [vmem:[#allocation5 + $0x290] sm:$0xf]  ;;  %v2747_v8 = vor.u32 %v3486_v0, %v2744_v1  ;;  %v3414_v10 = vld [vmem:[#allocation5 + $0x94] sm:$0xf]  ;;  %v2455_v14 = vor.u32 %v3418_v6, %v2454_v5  ;;  %v2592_v61 = vld [vmem:[#allocation5 + $0x1b8] sm:$0xf0]  ;;  %v2847_v1 = vor.u32 %v3515_v59, %v2846_v57 }
  0x57   :  { %952 = vmatpush.bf16.msrb.mxu1 %v2639_v11  ;;  %980 = vmatpush.bf16.msrb.mxu3 %v2643_v15  ;;  %v3482_v9 = vld [vmem:[#allocation5 + $0x2ac] sm:$0xf0]  ;;  %v2456_v11 = vld [vmem:[#allocation5 + $0xb0] sm:$0xf0]  ;;  %v3511_v62 = vld [vmem:[#allocation5 + $0x39c] sm:$0xf] }
  0x58   :  { %967 = vmatmul.bf16.vlgmr.msrb.gmra.mxu2 %v3913_v51  ;;  %939 = vmatmul.bf16.vlgmr.msrb.gmra.mxu0 %v3913_v51  ;;  %v3478_v12 = vld [vmem:[#allocation5 + $0x294] sm:$0xf]  ;;  %v2711_v15 = vor.u32 %v3482_v9, %v2710_v7  ;;  %v2678_v19 = vld [vmem:[#allocation5 + $0x250] sm:$0xf]  ;;  %v2848_v63 = vld [vmem:[#allocation5 + $0x3b8] sm:$0xf0] }
  0x59   :  { %987 = vmatpush.bf16.msra.mxu0 %v2615_v16  ;;  %1015 = vmatpush.bf16.msra.mxu2 %v2619_v18  ;;  %v2712_v13 = vld [vmem:[#allocation5 + $0x2b0] sm:$0xf0]  ;;  %v2459_v16 = vor.u32 %v3414_v10, %v2456_v11  ;;  %v3410_v18 = vld [vmem:[#allocation5 + $0x6c] sm:$0xf0]  ;;  %v2814_v5 = vld [vmem:[#allocation5 + $0x358] sm:$0xf]  ;;  %v2851_v6 = vor.u32 %v3511_v62, %v2848_v63 }
  0x5a   :  { %981 = vmatmul.bf16.vlgmr.msrb.gmra.mxu3 %v3915_v55  ;;  %953 = vmatmul.bf16.vlgmr.msrb.gmra.mxu1 %v3915_v55  ;;  %v2715_v20 = vor.u32 %v3478_v12, %v2712_v13  ;;  %v3474_v21 = vld [vmem:[#allocation5 + $0x26c] sm:$0xf0]  ;;  %v2424_v23 = vld [vmem:[#allocation5 + $0x70] sm:$0xf0]  ;;  %v3507_v7 = vld [vmem:[#allocation5 + $0x374] sm:$0xf0] }
  0x5b   :  { %1001 = vmatpush.bf16.msra.mxu1 %v2871_v17  ;;  %1029 = vmatpush.bf16.msra.mxu3 %v2875_v22  ;;  %v2422_v17 = vld [vmem:[#allocation5 + $0x50] sm:$0xf]  ;;  %v3406_v22 = vld [vmem:[#allocation5 + $0x54] sm:$0xf]  ;;  %v2560_v9 = vld [vmem:[#allocation5 + $0x178] sm:$0xf0]  ;;  %v2815_v13 = vor.u32 %v3507_v7, %v2814_v5 }
  0x5c   :  { %v3470_v24 = vld [vmem:[#allocation5 + $0x254] sm:$0xf]  ;;  %v2423_v26 = vor.u32 %v3410_v18, %v2422_v17  ;;  %v2390_v27 = vld [vmem:[#allocation5 + $0x10] sm:$0xf]  ;;  %v3503_v10 = vld [vmem:[#allocation5 + $0x35c] sm:$0xf] }
  0x5d   :  { %988 = vmatpush.bf16.msra.mxu0 %v2583_v28  ;;  %1016 = vmatpush.bf16.msra.mxu2 %v2587_v30  ;;  %v2680_v25 = vld [vmem:[#allocation5 + $0x270] sm:$0xf0]  ;;  %v3402_v28 = vld [vmem:[#allocation5 + $0x2c] sm:$0xf0]  ;;  %v2427_v30 = vor.u32 %v3406_v22, %v2424_v23  ;;  %v2816_v11 = vld [vmem:[#allocation5 + $0x378] sm:$0xf0] }
  0x5e   :  { %v2646_v31 = vld [vmem:[#allocation5 + $0x210] sm:$0xf]  ;;  %v3398_v33 = vld [vmem:[#allocation5 + $0x14] sm:$0xf]  ;;  %v2782_v17 = vld [vmem:[#allocation5 + $0x318] sm:$0xf]  ;;  %v2819_v18 = vor.u32 %v3503_v10, %v2816_v11 }
  0x5f   :  { %1002 = vmatpush.bf16.msra.mxu1 %v2839_v29  ;;  %1030 = vmatpush.bf16.msra.mxu3 %v2843_v34  ;;  %v2679_v29 = vor.u32 %v3474_v21, %v2678_v19  ;;  %v3466_v32 = vld [vmem:[#allocation5 + $0x22c] sm:$0xf0]  ;;  %v2683_v34 = vor.u32 %v3470_v24, %v2680_v25  ;;  %v2392_v35 = vld [vmem:[#allocation5 + $0x30] sm:$0xf0]  ;;  %v3499_v19 = vld [vmem:[#allocation5 + $0x334] sm:$0xf0] }
  0x60   :  { %v3462_v36 = vld [vmem:[#allocation5 + $0x214] sm:$0xf]  ;;  %v2647_v45 = vor.u32 %v3466_v32, %v2646_v31  ;;  %v2528_v21 = vld [vmem:[#allocation5 + $0x138] sm:$0xf0]  ;;  %v2783_v25 = vor.u32 %v3499_v19, %v2782_v17  ;;  %v3491_v31 = vld [vmem:[#allocation5 + $0x2f4] sm:$0xf0] }
  0x61   :  { %989 = vmatpush.bf16.msra.mxu0 %v2551_v40  ;;  %1017 = vmatpush.bf16.msra.mxu2 %v2555_v42  ;;  %v2648_v37 = vld [vmem:[#allocation5 + $0x230] sm:$0xf0]  ;;  %v2878_v40 = vld [vmem:[#allocation5 + $0x3d8] sm:$0xf]  ;;  %v3495_v22 = vld [vmem:[#allocation5 + $0x31c] sm:$0xf] }
  0x62   :  { %v3523_v42 = vld [vmem:[#allocation5 + $0x3f4] sm:$0xf0]  ;;  %v2651_v49 = vor.u32 %v3462_v36, %v2648_v37  ;;  %v2784_v23 = vld [vmem:[#allocation5 + $0x338] sm:$0xf0] }
  0x63   :  { %1003 = vmatpush.bf16.msra.mxu1 %v2807_v41  ;;  %1031 = vmatpush.bf16.msra.mxu3 %v2811_v46  ;;  %v2391_v41 = vor.u32 %v3402_v28, %v2390_v27  ;;  %v2395_v46 = vor.u32 %v3398_v33, %v2392_v35  ;;  %v2879_v52 = vor.u32 %v3523_v42, %v2878_v40  ;;  %v2494_v27 = vld [vmem:[#allocation5 + $0xd8] sm:$0xf]  ;;  %v3423_v32 = vld [vmem:[#allocation5 + $0xdc] sm:$0xf] }
  0x64   :  { %v3427_v28 = vld [vmem:[#allocation5 + $0xf4] sm:$0xf0]  ;;  %v2496_v33 = vld [vmem:[#allocation5 + $0xf8] sm:$0xf0] }
  0x65   :  { %990 = vmatpush.bf16.msra.mxu0 %v2519_v53  ;;  %1018 = vmatpush.bf16.msra.mxu2 %v2523_v56  ;;  %v2627_v53 = vor.u32 %v3455_v43, %v2624_v44  ;;  %v3451_v56 = vld [vmem:[#allocation5 + $0x1b4] sm:$0xf0]  ;;  %v2752_v35 = vld [vmem:[#allocation5 + $0x2f8] sm:$0xf0]  ;;  %v2495_v36 = vor.u32 %v3427_v28, %v2494_v27  ;;  %v2499_v38 = vor.u32 %v3423_v32, %v2496_v33  ;;  %v2998_v32 = vld [vmem:[#allocation8 + $0xe0] sm:$0xf] }
  0x66   :  { %v2462_v39 = vld [vmem:[#allocation5 + $0x98] sm:$0xf]  ;;  %v3415_v44 = vld [vmem:[#allocation5 + $0x9c] sm:$0xf] }
  0x67   :  { %1004 = vmatpush.bf16.msra.mxu1 %v2775_v54  ;;  %1032 = vmatpush.bf16.msra.mxu3 %v2779_v60  ;;  %v2590_v54 = vld [vmem:[#allocation5 + $0x198] sm:$0xf]  ;;  %v3447_v60 = vld [vmem:[#allocation5 + $0x19c] sm:$0xf] }
  0x68   :  { %v2591_v0 = vor.u32 %v3451_v56, %v2590_v54  ;;  %v3419_v40 = vld [vmem:[#allocation5 + $0xb4] sm:$0xf0]  ;;  %v2720_v47 = vld [vmem:[#allocation5 + $0x2b8] sm:$0xf0] }
  0x69   :  { %991 = vmatpush.bf16.msra.mxu0 %v2487_v2  ;;  %1019 = vmatpush.bf16.msra.mxu2 %v2491_v4  ;;  %v2595_v2 = vor.u32 %v3447_v60, %v2592_v61  ;;  %v3443_v4 = vld [vmem:[#allocation5 + $0x174] sm:$0xf0]  ;;  %v2463_v48 = vor.u32 %v3419_v40, %v2462_v39  ;;  %v2432_v59 = vld [vmem:[#allocation5 + $0x78] sm:$0xf0] }
  0x6a   :  { %v3483_v43 = vld [vmem:[#allocation5 + $0x2b4] sm:$0xf0]  ;;  %v3471_v60 = vld [vmem:[#allocation5 + $0x25c] sm:$0xf] }
  0x6b   :  { %1005 = vmatpush.bf16.msra.mxu1 %v2743_v3  ;;  %1033 = vmatpush.bf16.msra.mxu3 %v2747_v8  ;;  %v2558_v3 = vld [vmem:[#allocation5 + $0x158] sm:$0xf]  ;;  %v3439_v8 = vld [vmem:[#allocation5 + $0x15c] sm:$0xf] }
  0x6c   :  { %v2559_v12 = vor.u32 %v3443_v4, %v2558_v3  ;;  %v2686_v54 = vld [vmem:[#allocation5 + $0x258] sm:$0xf]  ;;  %v2688_v61 = vld [vmem:[#allocation5 + $0x278] sm:$0xf0] }
  0x6d   :  { %992 = vmatpush.bf16.msra.mxu0 %v2455_v14  ;;  %1020 = vmatpush.bf16.msra.mxu2 %v2459_v16  ;;  %v2563_v14 = vor.u32 %v3439_v8, %v2560_v9  ;;  %v3435_v16 = vld [vmem:[#allocation5 + $0x134] sm:$0xf0]  ;;  %v2691_v4 = vor.u32 %v3471_v60, %v2688_v61  ;;  %v2400_v7 = vld [vmem:[#allocation5 + $0x38] sm:$0xf0]  ;;  %v3549_v61 = vld [vmem:[#allocation8 + $0xc4] sm:$0xf0] }
  0x6e   :  { %v3475_v57 = vld [vmem:[#allocation5 + $0x274] sm:$0xf0]  ;;  %v3463_v8 = vld [vmem:[#allocation5 + $0x21c] sm:$0xf] }
  0x6f   :  { %1006 = vmatpush.bf16.msra.mxu1 %v2711_v15  ;;  %1034 = vmatpush.bf16.msra.mxu3 %v2715_v20  ;;  %v2526_v15 = vld [vmem:[#allocation5 + $0x118] sm:$0xf]  ;;  %v3431_v20 = vld [vmem:[#allocation5 + $0x11c] sm:$0xf]  ;;  %v2687_v63 = vor.u32 %v3475_v57, %v2686_v54  ;;  %v2918_v57 = vld [vmem:[#allocation8 + $0x40] sm:$0xf] }
  0x70   :  { %v2527_v24 = vor.u32 %v3435_v16, %v2526_v15  ;;  %v2654_v3 = vld [vmem:[#allocation5 + $0x218] sm:$0xf]  ;;  %v2656_v9 = vld [vmem:[#allocation5 + $0x238] sm:$0xf0] }
  0x71   :  { %993 = vmatpush.bf16.msra.mxu0 %v2423_v26  ;;  %1021 = vmatpush.bf16.msra.mxu2 %v2427_v30  ;;  %v2531_v26 = vor.u32 %v3431_v20, %v2528_v21  ;;  %v2787_v30 = vor.u32 %v3495_v22, %v2784_v23  ;;  %v3467_v5 = vld [vmem:[#allocation5 + $0x234] sm:$0xf0]  ;;  %v3539_v21 = vld [vmem:[#allocation8 + $0x74] sm:$0xf0] }
  0x72   :  { %v2655_v11 = vor.u32 %v3467_v5, %v2654_v3  ;;  %v2942_v20 = vld [vmem:[#allocation8 + $0x70] sm:$0xf] }
  0x73   :  { %1007 = vmatpush.bf16.msra.mxu1 %v2679_v29  ;;  %1035 = vmatpush.bf16.msra.mxu3 %v2683_v34  ;;  %v2750_v29 = vld [vmem:[#allocation5 + $0x2d8] sm:$0xf]  ;;  %v3487_v34 = vld [vmem:[#allocation5 + $0x2dc] sm:$0xf] }
  0x74   :  { %v2751_v37 = vor.u32 %v3491_v31, %v2750_v29  ;;  %v2755_v42 = vor.u32 %v3487_v34, %v2752_v35  ;;  %v3006_v22 = vld [vmem:[#allocation8 + $0xf0] sm:$0xf]  ;;  %v3537_v31 = vld [vmem:[#allocation8 + $0x64] sm:$0xf0] }
  0x75   :  { %994 = vmatpush.bf16.msra.mxu0 %v2391_v41  ;;  %1022 = vmatpush.bf16.msra.mxu2 %v2395_v46  ;;  %v2718_v41 = vld [vmem:[#allocation5 + $0x298] sm:$0xf]  ;;  %v3479_v46 = vld [vmem:[#allocation5 + $0x29c] sm:$0xf]  ;;  %v3553_v35 = vld [vmem:[#allocation8 + $0xe4] sm:$0xf0] }
  0x76   :  { %v2723_v56 = vor.u32 %v3479_v46, %v2720_v47  ;;  %v3551_v47 = vld [vmem:[#allocation8 + $0xd4] sm:$0xf0]  ;;  %v2910_v5 = vld [vmem:[#allocation8 + $0x30] sm:$0xf] }
  0x77   :  { %1008 = vmatpush.bf16.msra.mxu1 %v2647_v45  ;;  %1036 = vmatpush.bf16.msra.mxu3 %v2651_v49  ;;  %v2464_v45 = vld [vmem:[#allocation5 + $0xb8] sm:$0xf0]  ;;  %v2719_v49 = vor.u32 %v3483_v43, %v2718_v41  ;;  %v2926_v41 = vld [vmem:[#allocation8 + $0x50] sm:$0xf] }
  0x78   :  { %1023 = vmatmul.bf16.vlgmr.msra.gmra.mxu2 %v3913_v51  ;;  %995 = vmatmul.bf16.vlgmr.msra.gmra.mxu0 %v3913_v51  ;;  %v2990_v43 = vld [vmem:[#allocation8 + $0xd0] sm:$0xf] }
  0x79   :  { %1043 = vmatpush.bf16.msrb.mxu0 %v2623_v50  ;;  %1071 = vmatpush.bf16.msrb.mxu2 %v2627_v53  ;;  %v2467_v50 = vor.u32 %v3415_v44, %v2464_v45  ;;  %v3411_v53 = vld [vmem:[#allocation5 + $0x74] sm:$0xf0] }
  0x7a   :  { %1037 = vmatmul.bf16.vlgmr.msra.gmra.mxu3 %v3915_v55  ;;  %1009 = vmatmul.bf16.vlgmr.msra.gmra.mxu1 %v3915_v55 }
  0x7b   :  { %1057 = vmatpush.bf16.msrb.mxu1 %v2879_v52  ;;  %1085 = vmatpush.bf16.msrb.mxu3 %v2883_v58  ;;  %v2430_v52 = vld [vmem:[#allocation5 + $0x58] sm:$0xf]  ;;  %v3407_v58 = vld [vmem:[#allocation5 + $0x5c] sm:$0xf] }
  0x7c   :  { %v2431_v62 = vor.u32 %v3411_v53, %v2430_v52  ;;  %v2991_v53 = vor.u32 %v3551_v47, %v2990_v43  ;;  %v2886_v43 = vld [vmem:[#allocation8] sm:$0xf]  ;;  %v3541_v47 = vld [vmem:[#allocation8 + $0x84] sm:$0xf0] }
  0x7d   :  { %1044 = vmatpush.bf16.msrb.mxu0 %v2591_v0  ;;  %1072 = vmatpush.bf16.msrb.mxu2 %v2595_v2  ;;  %v2435_v0 = vor.u32 %v3407_v58, %v2432_v59  ;;  %v3403_v2 = vld [vmem:[#allocation5 + $0x34] sm:$0xf0]  ;;  %v3533_v58 = vld [vmem:[#allocation8 + $0x44] sm:$0xf0]  ;;  %v2982_v59 = vld [vmem:[#allocation8 + $0xc0] sm:$0xf] }
  0x7e   :  { %v2919_v60 = vor.u32 %v3533_v58, %v2918_v57 }
  0x7f   :  { %1058 = vmatpush.bf16.msrb.mxu1 %v2847_v1  ;;  %1086 = vmatpush.bf16.msrb.mxu3 %v2851_v6  ;;  %v2398_v1 = vld [vmem:[#allocation5 + $0x18] sm:$0xf]  ;;  %v3399_v6 = vld [vmem:[#allocation5 + $0x1c] sm:$0xf] }
  0x80   :  { %v2399_v10 = vor.u32 %v3403_v2, %v2398_v1 }
  0x81   :  { %1045 = vmatpush.bf16.msrb.mxu0 %v2559_v12  ;;  %1073 = vmatpush.bf16.msrb.mxu2 %v2563_v14  ;;  %v2403_v12 = vor.u32 %v3399_v6, %v2400_v7  ;;  %v3933_v14 = vld [vmem:[#allocation7] sm:$0xff]  ;;  %v2974_v7 = vld [vmem:[#allocation8 + $0xb0] sm:$0xf] }
  0x82   :  { %v219_v15 = vperm.slane %v3933_v14, 0  ;;  %v220_v19 = vperm.slane %v3933_v14, 1  ;;  %v3531_v6 = vld [vmem:[#allocation8 + $0x34] sm:$0xf0] }
  0x83   :  { %1059 = vmatpush.bf16.msrb.mxu1 %v2815_v13  ;;  %1087 = vmatpush.bf16.msrb.mxu3 %v2819_v18  ;;  %v2659_v13 = vor.u32 %v3463_v8, %v2656_v9  ;;  %v2911_v8 = vor.u32 %v3531_v6, %v2910_v5  ;;  %v3547_v9 = vld [vmem:[#allocation8 + $0xb4] sm:$0xf0]  ;;  %v3262_v6 = vld [vmem:[#allocation8 + $0x2f0] sm:$0xf] }
  0x84   :  { %v3603_v5 = vld [vmem:[#allocation8 + $0x274] sm:$0xf0] }
  0x85   :  { %1046 = vmatpush.bf16.msrb.mxu0 %v2527_v24  ;;  %1074 = vmatpush.bf16.msrb.mxu2 %v2531_v26  ;;  %v2943_v24 = vor.u32 %v3539_v21, %v2942_v20  ;;  %v3545_v21 = vld [vmem:[#allocation8 + $0xa4] sm:$0xf0] }
  0x87   :  { %1060 = vmatpush.bf16.msrb.mxu1 %v2783_v25  ;;  %1088 = vmatpush.bf16.msrb.mxu3 %v2787_v30  ;;  %v3555_v25 = vld [vmem:[#allocation8 + $0xf4] sm:$0xf0]  ;;  %v2934_v30 = vld [vmem:[#allocation8 + $0x60] sm:$0xf] }
  0x88   :  { %v3007_v28 = vor.u32 %v3555_v25, %v3006_v22  ;;  %v2935_v34 = vor.u32 %v3537_v31, %v2934_v30 }
  0x89   :  { %1047 = vmatpush.bf16.msrb.mxu0 %v2495_v36  ;;  %1075 = vmatpush.bf16.msrb.mxu2 %v2499_v38  ;;  %v2999_v38 = vor.u32 %v3553_v35, %v2998_v32 }
  0x8b   :  { %1061 = vmatpush.bf16.msrb.mxu1 %v2751_v37  ;;  %1089 = vmatpush.bf16.msrb.mxu3 %v2755_v42  ;;  %v3535_v42 = vld [vmem:[#allocation8 + $0x54] sm:$0xf0] }
  0x8c   :  { %v2927_v46 = vor.u32 %v3535_v42, %v2926_v41 }
  0x8d   :  { %1048 = vmatpush.bf16.msrb.mxu0 %v2463_v48  ;;  %1076 = vmatpush.bf16.msrb.mxu2 %v2467_v50 }
  0x8f   :  { %1062 = vmatpush.bf16.msrb.mxu1 %v2719_v49  ;;  %1090 = vmatpush.bf16.msrb.mxu3 %v2723_v56 }
  0x91   :  { %1049 = vmatpush.bf16.msrb.mxu0 %v2431_v62  ;;  %1077 = vmatpush.bf16.msrb.mxu2 %v2435_v0  ;;  %v2983_v0 = vor.u32 %v3549_v61, %v2982_v59 }
  0x93   :  { %1063 = vmatpush.bf16.msrb.mxu1 %v2687_v63  ;;  %1091 = vmatpush.bf16.msrb.mxu3 %v2691_v4 }
  0x95   :  { %1050 = vmatpush.bf16.msrb.mxu0 %v2399_v10  ;;  %1078 = vmatpush.bf16.msrb.mxu2 %v2403_v12 }
  0x97   :  { %1064 = vmatpush.bf16.msrb.mxu1 %v2655_v11  ;;  %1092 = vmatpush.bf16.msrb.mxu3 %v2659_v13 }
  0x98   :  { %1051 = vmatmul.bf16.vlgmr.msrb.gmra.mxu0 %v3913_v51  ;;  %1079 = vmatmul.bf16.vlgmr.msrb.gmra.mxu2 %v3913_v51 }
  0x99   :  { %2123 = vmatpush.bf16.msra.mxu0 %v2943_v24  ;;  %v221_v24 = vperm.slane %v3933_v14, 2 }
  0x9a   :  { %1065 = vmatmul.bf16.vlgmr.msrb.gmra.mxu1 %v3915_v55  ;;  %1093 = vmatmul.bf16.vlgmr.msrb.gmra.mxu3 %v3915_v55 }
  0x9b   :  { %2137 = vmatpush.bf16.msra.mxu1 %v3007_v28  ;;  %v2958_v28 = vld [vmem:[#allocation8 + $0x90] sm:$0xf] }
  0x9d   :  { %2124 = vmatpush.bf16.msra.mxu0 %v2935_v34 }
  0x9f   :  { %2138 = vmatpush.bf16.msra.mxu1 %v2999_v38 }
  0xa1   :  { %2125 = vmatpush.bf16.msra.mxu0 %v2927_v46 }
  0xa3   :  { %2139 = vmatpush.bf16.msra.mxu1 %v2991_v53  ;;  %v3134_v53 = vld [vmem:[#allocation8 + $0x1f0] sm:$0xf] }
  0xa5   :  { %2126 = vmatpush.bf16.msra.mxu0 %v2919_v60 }
  0xa7   :  { %2140 = vmatpush.bf16.msra.mxu1 %v2983_v0 }
  0xa9   :  { %2127 = vmatpush.bf16.msra.mxu0 %v2911_v8 }
  0xb5   :  { %v884_v16 = vpop.f32.mrf.mxu0 }
  0xb6   :  { %v885_v18 = vadd.f32 %v884_v16, %v219_v15 }
  0xb7   :  { %v898_v17 = vpop.f32.mrf.mxu1 }
  0xb8   :  { %v899_v27 = vadd.f32 %v898_v17, %v885_v18  ;;  %v2902_v17 = vld [vmem:[#allocation8 + $0x20] sm:$0xf]  ;;  %v3529_v18 = vld [vmem:[#allocation8 + $0x24] sm:$0xf0] }
  0xb9   :  { %v2903_v20 = vor.u32 %v3529_v18, %v2902_v17 }
  0xbb   :  { %v912_v23 = vpop.f32.mrf.mxu2  ;;  %2128 = vmatpush.bf16.msra.mxu0 %v2903_v20 }
  0xbc   :  { %v913_v26 = vadd.f32 %v912_v23, %v220_v19 }
  0xbd   :  { %v926_v51 = vpop.f32.mrf.mxu3  ;;  %v886_v29 = vpop.f32.mrf.mxu0 }
  0xbe   :  { %v927_v55 = vadd.f32 %v926_v51, %v913_v26  ;;  %v887_v33 = vadd.f32 %v886_v29, %v219_v15  ;;  %v2975_v15 = vor.u32 %v3547_v9, %v2974_v7  ;;  %v3527_v51 = vld [vmem:[#allocation8 + $0x14] sm:$0xf0] }
  0xbf   :  { %v900_v37 = vpop.f32.mrf.mxu1  ;;  %v3543_v29 = vld [vmem:[#allocation8 + $0x94] sm:$0xf0] }
  0xc0   :  { %v3937_v36 = vpack.c.bf16 %v927_v55, %v899_v27  ;;  %v901_v45 = vadd.f32 %v900_v37, %v887_v33  ;;  %2141 = vmatpush.bf16.msra.mxu1 %v2975_v15  ;;  %v2894_v27 = vld [vmem:[#allocation8 + $0x10] sm:$0xf]  ;;  %v2959_v34 = vor.u32 %v3543_v29, %v2958_v28  ;;  %v222_v37 = vperm.slane %v3933_v14, 3  ;;  %v3569_v15 = vld [vmem:[#allocation8 + $0x164] sm:$0xf0] }
  0xc1   :  { %v2895_v55 = vor.u32 %v3527_v51, %v2894_v27  ;;  %v3601_v29 = vld [vmem:[#allocation8 + $0x264] sm:$0xf0] }
  0xc2   :  { %v1107_v39 = vunpack.c.l.bf16 %v3937_v36  ;;  %v1108_v40 = vunpack.c.h.bf16 %v3937_v36  ;;  %v3573_v36 = vld [vmem:[#allocation8 + $0x184] sm:$0xf0] }
  0xc3   :  { %v914_v44 = vpop.f32.mrf.mxu2  ;;  %2129 = vmatpush.bf16.msra.mxu0 %v2895_v55  ;;  %v3190_v55 = vld [vmem:[#allocation8 + $0x260] sm:$0xf] }
  0xc4   :  { %v1123_v48 = vmul.f32 1.703125, %v1107_v39  ;;  %v1124_v49 = vmul.f32 1.703125, %v1108_v40  ;;  %v915_v50 = vadd.f32 %v914_v44, %v220_v19  ;;  %v2966_v19 = vld [vmem:[#allocation8 + $0xa0] sm:$0xf]  ;;  %v3525_v44 = vld [vmem:[#allocation8 + $0x4] sm:$0xf0] }
  0xc5   :  { %v928_v52 = vpop.f32.mrf.mxu3  ;;  %v2967_v23 = vor.u32 %v3545_v21, %v2966_v19  ;;  %v2887_v46 = vor.u32 %v3525_v44, %v2886_v43  ;;  %v3126_v21 = vld [vmem:[#allocation8 + $0x1e0] sm:$0xf]  ;;  %v3118_v44 = vld [vmem:[#allocation8 + $0x1d0] sm:$0xf] }
  0xc6   :  { %v1139_v54 = vpack.c.bf16 %v1124_v49, %v1123_v48  ;;  %v929_v56 = vadd.f32 %v928_v52, %v915_v50  ;;  %v3070_v48 = vld [vmem:[#allocation8 + $0x170] sm:$0xf]  ;;  %v3571_v49 = vld [vmem:[#allocation8 + $0x174] sm:$0xf0] }
  0xc7   :  { %2142 = vmatpush.bf16.msra.mxu1 %v2967_v23  ;;  %2130 = vmatpush.bf16.msra.mxu0 %v2887_v46  ;;  %v3071_v58 = vor.u32 %v3571_v49, %v3070_v48 }
  0xc8   :  { %v1147_v62 = vxor.u32 2147516416, %v1139_v54  ;;  %v3945_v63 = vpack.c.bf16 %v929_v56, %v901_v45  ;;  %v2950_v45 = vld [vmem:[#allocation8 + $0x80] sm:$0xf]  ;;  %v3587_v54 = vld [vmem:[#allocation8 + $0x1f4] sm:$0xf0] }
  0xc9   :  { %v2951_v57 = vor.u32 %v3541_v47, %v2950_v45  ;;  %v3135_v59 = vor.u32 %v3587_v54, %v3134_v53  ;;  %2151 = vmatpush.bf16.msra.mxu2 %v3071_v58  ;;  %v3583_v45 = vld [vmem:[#allocation8 + $0x1d4] sm:$0xf0] }
  0xca   :  { %v1155_v1 = vunpack.c.l.bf16 %v1147_v62  ;;  %v1156_v2 = vunpack.c.h.bf16 %v1147_v62  ;;  %v1115_v3 = vunpack.c.l.bf16 %v3945_v63  ;;  %v1116_v4 = vunpack.c.h.bf16 %v3945_v63 }
  0xcb   :  { %2143 = vmatpush.bf16.msra.mxu1 %v2959_v34  ;;  %2165 = vmatpush.bf16.msra.mxu3 %v3135_v59  ;;  %v3054_v34 = vld [vmem:[#allocation8 + $0x150] sm:$0xf] }
  0xcc   :  { %v1171_v10 = vmul.f32 1.442695, %v1155_v1  ;;  %v1173_v11 = vmul.f32 1.442695, %v1156_v2  ;;  %v1131_v12 = vmul.f32 1.703125, %v1115_v3  ;;  %v1132_v13 = vmul.f32 1.703125, %v1116_v4 }
  0xcd   :  { %v3198_v2 = vld [vmem:[#allocation8 + $0x270] sm:$0xf] }
  0xce   :  { %3664 = vpow2.f32 %v1171_v10  ;;  %v1143_v16 = vpack.c.bf16 %v1132_v13, %v1131_v12  ;;  %v3619_v12 = vld [vmem:[#allocation8 + $0x2f4] sm:$0xf0]  ;;  %v3062_v13 = vld [vmem:[#allocation8 + $0x160] sm:$0xf] }
  0xcf   :  { %3666 = vpow2.f32 %v1173_v11  ;;  %2144 = vmatpush.bf16.msra.mxu1 %v2951_v57  ;;  %v3199_v11 = vor.u32 %v3603_v5, %v3198_v2  ;;  %v3263_v19 = vor.u32 %v3619_v12, %v3262_v6  ;;  %v3063_v20 = vor.u32 %v3569_v15, %v3062_v13  ;;  %v3615_v2 = vld [vmem:[#allocation8 + $0x2d4] sm:$0xf0]  ;;  %v3046_v5 = vld [vmem:[#allocation8 + $0x140] sm:$0xf]  ;;  %v3565_v6 = vld [vmem:[#allocation8 + $0x144] sm:$0xf0] }
  0xd0   :  { %v1151_v22 = vxor.u32 2147516416, %v1143_v16  ;;  %v3119_v57 = vor.u32 %v3583_v45, %v3118_v44  ;;  %v3110_v12 = vld [vmem:[#allocation8 + $0x1c0] sm:$0xf]  ;;  %v3581_v13 = vld [vmem:[#allocation8 + $0x1c4] sm:$0xf0] }
  0xd1   :  { %2179 = vmatpush.bf16.msrb.mxu0 %v3199_v11  ;;  %2152 = vmatpush.bf16.msra.mxu2 %v3063_v20 }
  0xd2   :  { %v1163_v25 = vunpack.c.l.bf16 %v1151_v22  ;;  %v1164_v26 = vunpack.c.h.bf16 %v1151_v22  ;;  %v3585_v22 = vld [vmem:[#allocation8 + $0x1e4] sm:$0xf0] }
  0xd3   :  { %2193 = vmatpush.bf16.msrb.mxu1 %v3263_v19  ;;  %v3127_v28 = vor.u32 %v3585_v22, %v3126_v21  ;;  %v3111_v19 = vor.u32 %v3581_v13, %v3110_v12  ;;  %v3158_v12 = vld [vmem:[#allocation8 + $0x220] sm:$0xf]  ;;  %v3593_v13 = vld [vmem:[#allocation8 + $0x224] sm:$0xf0] }
  0xd4   :  { %v3665_v30 = vpop.eup %3664  ;;  %v1187_v31 = vmul.f32 1.442695, %v1163_v25  ;;  %v1189_v32 = vmul.f32 1.442695, %v1164_v26 }
  0xd5   :  { %v940_v33 = vpop.f32.mrf.mxu0  ;;  %v3667_v35 = vpop.eup %3666  ;;  %2166 = vmatpush.bf16.msra.mxu3 %v3127_v28 }
  0xd6   :  { %v1203_v41 = vpack.c.bf16 %v3667_v35, %v3665_v30  ;;  %3668 = vpow2.f32 %v1187_v31  ;;  %v941_v42 = vadd.f32 %v940_v33, %v221_v24  ;;  %v3254_v30 = vld [vmem:[#allocation8 + $0x2e0] sm:$0xf]  ;;  %v3617_v33 = vld [vmem:[#allocation8 + $0x2e4] sm:$0xf0]  ;;  %v3567_v35 = vld [vmem:[#allocation8 + $0x154] sm:$0xf0] }
  0xd7   :  { %v954_v38 = vpop.f32.mrf.mxu1  ;;  %3670 = vpow2.f32 %v1189_v32  ;;  %v3255_v43 = vor.u32 %v3617_v33, %v3254_v30  ;;  %v3038_v30 = vld [vmem:[#allocation8 + $0x130] sm:$0xf] }
  0xd8   :  { %v1211_v50 = vunpack.c.l.bf16 %v1203_v41  ;;  %v1212_v52 = vunpack.c.h.bf16 %v1203_v41  ;;  %v955_v0 = vadd.f32 %v954_v38, %v941_v42  ;;  %v3191_v42 = vor.u32 %v3601_v29, %v3190_v55  ;;  %v3613_v29 = vld [vmem:[#allocation8 + $0x2c4] sm:$0xf0] }
  0xd9   :  { %2194 = vmatpush.bf16.msrb.mxu1 %v3255_v43  ;;  %2167 = vmatpush.bf16.msra.mxu3 %v3119_v57  ;;  %v3561_v57 = vld [vmem:[#allocation8 + $0x124] sm:$0xf0] }
  0xda   :  { %v1227_v60 = vadd.f32 1.0, %v1211_v50  ;;  %v1228_v61 = vadd.f32 1.0, %v1212_v52  ;;  %v3866_v52 = vmov 1065369472   ;;  %2180 = vmatpush.bf16.msrb.mxu0 %v3191_v42  ;;  %v3579_v42 = vld [vmem:[#allocation8 + $0x1b4] sm:$0xf0] }
  0xdb   :  { %v968_v56 = vpop.f32.mrf.mxu2  ;;  %v3965_v53 = vunpack.c.h.bf16 %v3866_v52  ;;  %v3969_v58 = vunpack.c.l.bf16 %v3866_v52 }
  0xdc   :  { %v969_v62 = vadd.f32 %v968_v56, %v222_v37  ;;  %v3669_v7 = vpop.eup %3668  ;;  %v1243_v8 = vpack.c.bf16 %v1228_v61, %v1227_v60  ;;  %v3055_v56 = vor.u32 %v3567_v35, %v3054_v34  ;;  %v3182_v61 = vld [vmem:[#allocation8 + $0x250] sm:$0xf] }
  0xdd   :  { %v982_v1 = vpop.f32.mrf.mxu3  ;;  %v942_v10 = vpop.f32.mrf.mxu0  ;;  %2168 = vmatpush.bf16.msra.mxu3 %v3111_v19  ;;  %v3022_v19 = vld [vmem:[#allocation8 + $0x110] sm:$0xf] }
  0xde   :  { %v983_v9 = vadd.f32 %v982_v1, %v969_v62  ;;  %v3671_v16 = vpop.eup %3670  ;;  %v943_v17 = vadd.f32 %v942_v10, %v221_v24  ;;  %v1253_v23 = vunpack.c.h.bf16 %v1243_v8  ;;  %v1254_v25 = vunpack.c.l.bf16 %v1243_v8  ;;  %v3599_v62 = vld [vmem:[#allocation8 + $0x254] sm:$0xf0]  ;;  %2153 = vmatpush.bf16.msra.mxu2 %v3055_v56  ;;  %v3030_v56 = vld [vmem:[#allocation8 + $0x120] sm:$0xf] }
  0xdf   :  { %v956_v18 = vpop.f32.mrf.mxu1  ;;  %v1207_v26 = vpack.c.bf16 %v3671_v16, %v3669_v7 }
  0xe0   :  { %v3957_v27 = vpack.c.bf16 %v983_v9, %v955_v0  ;;  %v957_v51 = vadd.f32 %v956_v18, %v943_v17  ;;  %3672 = vrcp.f32 %v1253_v23  ;;  %v3246_v0 = vld [vmem:[#allocation8 + $0x2d0] sm:$0xf]  ;;  %v3047_v18 = vor.u32 %v3565_v6, %v3046_v5  ;;  %v3174_v23 = vld [vmem:[#allocation8 + $0x240] sm:$0xf] }
  0xe1   :  { %v1219_v24 = vunpack.c.l.bf16 %v1207_v26  ;;  %v1220_v31 = vunpack.c.h.bf16 %v1207_v26  ;;  %3674 = vrcp.f32 %v1254_v25  ;;  %v3247_v11 = vor.u32 %v3615_v2, %v3246_v0  ;;  %v3597_v25 = vld [vmem:[#allocation8 + $0x244] sm:$0xf0]  ;;  %v3238_v26 = vld [vmem:[#allocation8 + $0x2c0] sm:$0xf] }
  0xe2   :  { %v1109_v32 = vunpack.c.l.bf16 %v3957_v27  ;;  %v1110_v38 = vunpack.c.h.bf16 %v3957_v27  ;;  %2154 = vmatpush.bf16.msra.mxu2 %v3047_v18  ;;  %v3175_v55 = vor.u32 %v3597_v25, %v3174_v23  ;;  %v3239_v35 = vor.u32 %v3613_v29, %v3238_v26  ;;  %v3094_v0 = vld [vmem:[#allocation8 + $0x1a0] sm:$0xf]  ;;  %v3609_v18 = vld [vmem:[#allocation8 + $0x2a4] sm:$0xf0]  ;;  %v3542_v27 = vld [vmem:[#allocation8 + $0x94] sm:$0xf] }
  0xe3   :  { %v970_v41 = vpop.f32.mrf.mxu2  ;;  %v1235_v46 = vadd.f32 1.0, %v1219_v24  ;;  %v1236_v47 = vadd.f32 1.0, %v1220_v31  ;;  %2195 = vmatpush.bf16.msrb.mxu1 %v3247_v11  ;;  %v3563_v24 = vld [vmem:[#allocation8 + $0x134] sm:$0xf0]  ;;  %v3031_v6 = vor.u32 %v3561_v57, %v3030_v56 }
  0xe4   :  { %v1125_v48 = vmul.f32 1.703125, %v1109_v32  ;;  %v971_v49 = vadd.f32 %v970_v41, %v222_v37  ;;  %v1126_v54 = vmul.f32 1.703125, %v1110_v38  ;;  %v3183_v37 = vor.u32 %v3599_v62, %v3182_v61  ;;  %v3102_v41 = vld [vmem:[#allocation8 + $0x1b0] sm:$0xf] }
  0xe5   :  { %v984_v50 = vpop.f32.mrf.mxu3  ;;  %v1247_v59 = vpack.c.bf16 %v1236_v47, %v1235_v46  ;;  %v3039_v45 = vor.u32 %v3563_v24, %v3038_v30  ;;  %v3103_v46 = vor.u32 %v3579_v42, %v3102_v41  ;;  %v223_v62 = vperm.slane %v3933_v14, 4 }
  0xe6   :  { %v985_v60 = vadd.f32 %v984_v50, %v971_v49  ;;  %v1140_v1 = vpack.c.bf16 %v1126_v54, %v1125_v48  ;;  %v3673_v7 = vpop.eup %3672  ;;  %2181 = vmatpush.bf16.msrb.mxu0 %v3183_v37  ;;  %v3166_v48 = vld [vmem:[#allocation8 + $0x230] sm:$0xf]  ;;  %v3595_v49 = vld [vmem:[#allocation8 + $0x234] sm:$0xf0] }
  0xe7   :  { %v1281_v8 = vunpack.c.h.bf16 %v1247_v59  ;;  %v1282_v9 = vunpack.c.l.bf16 %v1247_v59  ;;  %v3675_v15 = vpop.eup %3674  ;;  %v1256_v16 = vmul.f32 %v3673_v7, %v3965_v53  ;;  %2196 = vmatpush.bf16.msrb.mxu1 %v3239_v35  ;;  %v3230_v50 = vld [vmem:[#allocation8 + $0x2b0] sm:$0xf]  ;;  %2155 = vmatpush.bf16.msra.mxu2 %v3039_v45  ;;  %v3167_v52 = vor.u32 %v3595_v49, %v3166_v48  ;;  %v3611_v54 = vld [vmem:[#allocation8 + $0x2b4] sm:$0xf0] }
  0xe8   :  { %v3971_v10 = vpack.c.bf16 %v985_v60, %v957_v51  ;;  %v1148_v17 = vxor.u32 2147516416, %v1140_v1  ;;  %v1258_v20 = vmul.f32 %v3675_v15, %v3969_v58  ;;  %2169 = vmatpush.bf16.msra.mxu3 %v3103_v46  ;;  %v3577_v1 = vld [vmem:[#allocation8 + $0x1a4] sm:$0xf0]  ;;  %v3231_v5 = vor.u32 %v3611_v54, %v3230_v50  ;;  %v3222_v15 = vld [vmem:[#allocation8 + $0x2a0] sm:$0xf] }
  0xe9   :  { %3676 = vrcp.f32 %v1281_v8  ;;  %v3095_v7 = vor.u32 %v3577_v1, %v3094_v0  ;;  %v3575_v35 = vld [vmem:[#allocation8 + $0x194] sm:$0xf0]  ;;  %v3150_v45 = vld [vmem:[#allocation8 + $0x210] sm:$0xf]  ;;  %v3557_v54 = vld [vmem:[#allocation8 + $0x104] sm:$0xf0] }
  0xea   :  { %v1117_v21 = vunpack.c.l.bf16 %v3971_v10  ;;  %v1118_v22 = vunpack.c.h.bf16 %v3971_v10  ;;  %3678 = vrcp.f32 %v1282_v9  ;;  %v1157_v51 = vunpack.c.l.bf16 %v1148_v17  ;;  %2182 = vmatpush.bf16.msrb.mxu0 %v3175_v55  ;;  %v3086_v55 = vld [vmem:[#allocation8 + $0x190] sm:$0xf]  ;;  %v3591_v46 = vld [vmem:[#allocation8 + $0x214] sm:$0xf0] }
  0xeb   :  { %v1158_v28 = vunpack.c.h.bf16 %v1148_v17  ;;  %v3977_v31 = vpack.c.bf16 %v1256_v16, %v1258_v20  ;;  %2197 = vmatpush.bf16.msrb.mxu1 %v3231_v5  ;;  %2156 = vmatpush.bf16.msra.mxu2 %v3031_v6  ;;  %v3159_v17 = vor.u32 %v3593_v13, %v3158_v12  ;;  %v3559_v20 = vld [vmem:[#allocation8 + $0x114] sm:$0xf0]  ;;  %v3151_v49 = vor.u32 %v3591_v46, %v3150_v45  ;;  %v3605_v13 = vld [vmem:[#allocation8 + $0x284] sm:$0xf0] }
  0xec   :  { %v1133_v33 = vmul.f32 1.703125, %v1117_v21  ;;  %v1134_v34 = vmul.f32 1.703125, %v1118_v22  ;;  %v1175_v43 = vmul.f32 1.442695, %v1157_v51  ;;  %2170 = vmatpush.bf16.msra.mxu3 %v3095_v7  ;;  %v3607_v50 = vld [vmem:[#allocation8 + $0x294] sm:$0xf0] }
  0xed   :  { %v1177_v44 = vmul.f32 1.442695, %v1158_v28  ;;  %v1309_v60 = vunpack.c.l.bf16 %v3977_v31  ;;  %v1310_v16 = vunpack.c.h.bf16 %v3977_v31  ;;  %v3223_v28 = vor.u32 %v3609_v18, %v3222_v15  ;;  %v3589_v7 = vld [vmem:[#allocation8 + $0x204] sm:$0xf0]  ;;  %v3326_v15 = vld [vmem:[#allocation8 + $0x370] sm:$0xf] }
  0xee   :  { %v1144_v47 = vpack.c.bf16 %v1134_v34, %v1133_v33  ;;  %3680 = vpow2.f32 %v1175_v43  ;;  %2183 = vmatpush.bf16.msrb.mxu0 %v3167_v52  ;;  %v224_v31 = vperm.slane %v3933_v14, 5  ;;  %v3023_v34 = vor.u32 %v3559_v20, %v3022_v19  ;;  %v3014_v52 = vld [vmem:[#allocation8 + $0x100] sm:$0xf]  ;;  %v3635_v20 = vld [vmem:[#allocation8 + $0x374] sm:$0xf0] }
  0xef   :  { %v3677_v59 = vpop.eup %3676  ;;  %3682 = vpow2.f32 %v1177_v44  ;;  %v1325_v30 = vmul.f32 %v1309_v60, %v1107_v39  ;;  %v3087_v44 = vor.u32 %v3575_v35, %v3086_v55  ;;  %v1326_v39 = vmul.f32 %v1310_v16, %v1108_v40  ;;  %2198 = vmatpush.bf16.msrb.mxu1 %v3223_v28 }
  0xf0   :  { %v1152_v61 = vxor.u32 2147516416, %v1144_v47  ;;  %v3679_v37 = vpop.eup %3678  ;;  %v1284_v2 = vmul.f32 %v3677_v59, %v3965_v53  ;;  %v3214_v47 = vld [vmem:[#allocation8 + $0x290] sm:$0xf]  ;;  %2157 = vmatpush.bf16.msra.mxu2 %v3023_v34  ;;  %v3015_v60 = vor.u32 %v3557_v54, %v3014_v52  ;;  %v3327_v55 = vor.u32 %v3635_v20, %v3326_v15  ;;  %v3382_v52 = vld [vmem:[#allocation8 + $0x3e0] sm:$0xf] }
  0xf1   :  { %v1286_v8 = vmul.f32 %v3679_v37, %v3969_v58  ;;  %2171 = vmatpush.bf16.msra.mxu3 %v3087_v44  ;;  %v3215_v59 = vor.u32 %v3607_v50, %v3214_v47  ;;  %v3633_v50 = vld [vmem:[#allocation8 + $0x364] sm:$0xf0]  ;;  %v2928_v20 = vld [vmem:[#allocation8 + $0x58] sm:$0xf0] }
  0xf2   :  { %v1165_v9 = vunpack.c.l.bf16 %v1152_v61  ;;  %v1166_v11 = vunpack.c.h.bf16 %v1152_v61  ;;  %2184 = vmatpush.bf16.msrb.mxu0 %v3159_v17  ;;  %v3078_v61 = vld [vmem:[#allocation8 + $0x180] sm:$0xf] }
  0xf3   :  { %v1287_v23 = vpack.c.bf16 %v1284_v2, %v1286_v8  ;;  %v3079_v63 = vor.u32 %v3573_v36, %v3078_v61  ;;  %v3206_v8 = vld [vmem:[#allocation8 + $0x280] sm:$0xf]  ;;  %2199 = vmatpush.bf16.msrb.mxu1 %v3215_v59  ;;  %v3649_v59 = vld [vmem:[#allocation8 + $0x3e4] sm:$0xf0]  ;;  %v2936_v61 = vld [vmem:[#allocation8 + $0x68] sm:$0xf0] }
  0xf4   :  { %v1191_v25 = vmul.f32 1.442695, %v1165_v9  ;;  %v1193_v26 = vmul.f32 1.442695, %v1166_v11  ;;  %v3681_v29 = vpop.eup %3680  ;;  %2158 = vmatpush.bf16.msra.mxu2 %v3015_v60  ;;  %v3207_v19 = vor.u32 %v3605_v13, %v3206_v8  ;;  %v3536_v60 = vld [vmem:[#allocation8 + $0x64] sm:$0xf] }
  0xf5   :  { %v996_v51 = vpop.f32.mrf.mxu0  ;;  %v3683_v41 = vpop.eup %3682  ;;  %v1317_v42 = vunpack.c.l.bf16 %v1287_v23  ;;  %v1318_v43 = vunpack.c.h.bf16 %v1287_v23  ;;  %v3390_v23 = vld [vmem:[#allocation8 + $0x3f0] sm:$0xf]  ;;  %2172 = vmatpush.bf16.msra.mxu3 %v3079_v63  ;;  %v3383_v63 = vor.u32 %v3649_v59, %v3382_v52  ;;  %v3548_v59 = vld [vmem:[#allocation8 + $0xc4] sm:$0xf] }
  0xf6   :  { %v997_v24 = vadd.f32 %v996_v51, %v223_v62  ;;  %3684 = vpow2.f32 %v1191_v25  ;;  %v1204_v48 = vpack.c.bf16 %v3683_v41, %v3681_v29  ;;  %2185 = vmatpush.bf16.msrb.mxu0 %v3151_v49  ;;  %v3651_v25 = vld [vmem:[#allocation8 + $0x3f4] sm:$0xf0]  ;;  %v3538_v29 = vld [vmem:[#allocation8 + $0x74] sm:$0xf]  ;;  %v3318_v49 = vld [vmem:[#allocation8 + $0x360] sm:$0xf] }
  0xf7   :  { %v1010_v33 = vpop.f32.mrf.mxu1  ;;  %3686 = vpow2.f32 %v1193_v26  ;;  %v1333_v56 = vmul.f32 %v1317_v42, %v1115_v3  ;;  %v1334_v57 = vmul.f32 %v1318_v43, %v1116_v4  ;;  %v3142_v4 = vld [vmem:[#allocation8 + $0x200] sm:$0xf]  ;;  %v3391_v41 = vor.u32 %v3651_v25, %v3390_v23  ;;  %v3008_v43 = vld [vmem:[#allocation8 + $0xf8] sm:$0xf0]  ;;  %2200 = vmatpush.bf16.msrb.mxu1 %v3207_v19  ;;  %v3374_v13 = vld [vmem:[#allocation8 + $0x3d0] sm:$0xf] }
  0xf8   :  { %v1213_v40 = vunpack.c.l.bf16 %v1204_v48  ;;  %v1214_v0 = vunpack.c.h.bf16 %v1204_v48  ;;  %v1011_v37 = vadd.f32 %v1010_v33, %v997_v24  ;;  %v3143_v12 = vor.u32 %v3589_v7, %v3142_v4  ;;  %v3554_v24 = vld [vmem:[#allocation8 + $0xf4] sm:$0xf]  ;;  %2207 = vmatpush.bf16.msrb.mxu2 %v3327_v55  ;;  %v3000_v7 = vld [vmem:[#allocation8 + $0xe8] sm:$0xf0] }
  0xf9   :  { %v4001_v6 = vpack.c.bf16 %v1333_v56, %v1325_v30  ;;  %v4003_v3 = vpack.c.bf16 %v1334_v57, %v1326_v39  ;;  %v2944_v30 = vld [vmem:[#allocation8 + $0x78] sm:$0xf0]  ;;  %v3011_v46 = vor.u32 %v3554_v24, %v3008_v43  ;;  %2221 = vmatpush.bf16.msrb.mxu3 %v3391_v41  ;;  %v3319_v57 = vor.u32 %v3633_v50, %v3318_v49  ;;  %v3534_v19 = vld [vmem:[#allocation8 + $0x54] sm:$0xf]  ;;  %v3629_v43 = vld [vmem:[#allocation8 + $0x344] sm:$0xf0] }
  0xfa   :  { %v1229_v9 = vadd.f32 1.0, %v1213_v40  ;;  %v1230_v11 = vadd.f32 1.0, %v1214_v0  ;;  %2186 = vmatpush.bf16.msrb.mxu0 %v3143_v12  ;;  %v2947_v42 = vor.u32 %v3538_v29, %v2944_v30  ;;  %v2939_v4 = vor.u32 %v3536_v60, %v2936_v61  ;;  %v3631_v12 = vld [vmem:[#allocation8 + $0x354] sm:$0xf0]  ;;  %v3532_v49 = vld [vmem:[#allocation8 + $0x44] sm:$0xf] }
  0xfb   :  { %v1024_v1 = vpop.f32.mrf.mxu2  ;;  %2131 = vmatmul.bf16.vlgmr.msra.gmra.mxu0 %v4001_v6  ;;  %2145 = vmatmul.bf16.vlgmr.msra.gmra.mxu1 %v4003_v3  ;;  %v225_v24 = vperm.slane %v3933_v14, 6  ;;  %v2920_v50 = vld [vmem:[#allocation8 + $0x48] sm:$0xf0] }
  0xfc   :  { %v1025_v2 = vadd.f32 %v1024_v1, %v224_v31  ;;  %v3685_v16 = vpop.eup %3684  ;;  %v1244_v51 = vpack.c.bf16 %v1230_v11, %v1229_v9  ;;  %2249 = vmatpush.bf16.msra.mxu1 %v3011_v46  ;;  %2208 = vmatpush.bf16.msrb.mxu2 %v3319_v57  ;;  %v3310_v11 = vld [vmem:[#allocation8 + $0x350] sm:$0xf]  ;;  %v2984_v60 = vld [vmem:[#allocation8 + $0xc8] sm:$0xf0] }
  0xfd   :  { %v1038_v5 = vpop.f32.mrf.mxu3  ;;  %v998_v18 = vpop.f32.mrf.mxu0  ;;  %2222 = vmatpush.bf16.msrb.mxu3 %v3383_v63  ;;  %v3627_v63 = vld [vmem:[#allocation8 + $0x334] sm:$0xf0] }
  0xfe   :  { %v1039_v17 = vadd.f32 %v1038_v5, %v1025_v2  ;;  %v3687_v26 = vpop.eup %3686  ;;  %v999_v28 = vadd.f32 %v998_v18, %v223_v62  ;;  %v1260_v44 = vunpack.c.h.bf16 %v1244_v51  ;;  %v1261_v45 = vunpack.c.l.bf16 %v1244_v51  ;;  %2235 = vmatpush.bf16.msra.mxu0 %v2947_v42  ;;  %v3647_v18 = vld [vmem:[#allocation8 + $0x3d4] sm:$0xf0]  ;;  %v3550_v51 = vld [vmem:[#allocation8 + $0xd4] sm:$0xf]  ;;  %v3302_v42 = vld [vmem:[#allocation8 + $0x340] sm:$0xf] }
  0xff   :  { %v1208_v33 = vpack.c.bf16 %v3687_v26, %v3685_v16  ;;  %v1012_v35 = vpop.f32.mrf.mxu1  ;;  %v2931_v26 = vor.u32 %v3534_v19, %v2928_v20 }
 0x100   :  { %v4009_v34 = vpack.c.bf16 %v1039_v17, %v1011_v37  ;;  %3688 = vrcp.f32 %v1260_v44  ;;  %v1013_v56 = vadd.f32 %v1012_v35, %v999_v28  ;;  %v3552_v37 = vld [vmem:[#allocation8 + $0xe4] sm:$0xf]  ;;  %v3311_v17 = vor.u32 %v3631_v12, %v3310_v11  ;;  %v2992_v28 = vld [vmem:[#allocation8 + $0xd8] sm:$0xf0]  ;;  %v3366_v44 = vld [vmem:[#allocation8 + $0x3c0] sm:$0xf] }
 0x101   :  { %v1221_v47 = vunpack.c.l.bf16 %v1208_v33  ;;  %v1222_v62 = vunpack.c.h.bf16 %v1208_v33  ;;  %3690 = vrcp.f32 %v1261_v45  ;;  %v3003_v9 = vor.u32 %v3552_v37, %v3000_v7  ;;  %v3358_v7 = vld [vmem:[#allocation8 + $0x3b0] sm:$0xf] }
 0x102   :  { %v1111_v39 = vunpack.c.l.bf16 %v4009_v34  ;;  %v1112_v48 = vunpack.c.h.bf16 %v4009_v34  ;;  %2236 = vmatpush.bf16.msra.mxu0 %v2939_v4  ;;  %2209 = vmatpush.bf16.msrb.mxu2 %v3311_v17  ;;  %v2995_v33 = vor.u32 %v3550_v51, %v2992_v28  ;;  %v2976_v17 = vld [vmem:[#allocation8 + $0xb8] sm:$0xf0]  ;;  %v3286_v28 = vld [vmem:[#allocation8 + $0x320] sm:$0xf]  ;;  %v3616_v34 = vld [vmem:[#allocation8 + $0x2e4] sm:$0xf] }
 0x103   :  { %v1026_v54 = vpop.f32.mrf.mxu2  ;;  %v1237_v36 = vadd.f32 1.0, %v1221_v47  ;;  %v1238_v40 = vadd.f32 1.0, %v1222_v62  ;;  %2250 = vmatpush.bf16.msra.mxu1 %v3003_v9  ;;  %v3645_v62 = vld [vmem:[#allocation8 + $0x3c4] sm:$0xf0]  ;;  %v3530_v9 = vld [vmem:[#allocation8 + $0x34] sm:$0xf] }
 0x104   :  { %v1127_v0 = vmul.f32 1.703125, %v1111_v39  ;;  %v1128_v2 = vmul.f32 1.703125, %v1112_v48  ;;  %v1027_v5 = vadd.f32 %v1026_v54, %v224_v31  ;;  %v3375_v31 = vor.u32 %v3647_v18, %v3374_v13 }
 0x105   :  { %v1040_v1 = vpop.f32.mrf.mxu3  ;;  %v1248_v8 = vpack.c.bf16 %v1238_v40, %v1237_v36  ;;  %v3367_v57 = vor.u32 %v3645_v62, %v3366_v44  ;;  %v2904_v62 = vld [vmem:[#allocation8 + $0x28] sm:$0xf0] }
 0x106   :  { %v1141_v15 = vpack.c.bf16 %v1128_v2, %v1127_v0  ;;  %v1041_v16 = vadd.f32 %v1040_v1, %v1027_v5  ;;  %v3689_v55 = vpop.eup %3688  ;;  %2223 = vmatpush.bf16.msrb.mxu3 %v3375_v31  ;;  %2237 = vmatpush.bf16.msra.mxu0 %v2931_v26  ;;  %v2923_v0 = vor.u32 %v3532_v49, %v2920_v50  ;;  %v3294_v5 = vld [vmem:[#allocation8 + $0x330] sm:$0xf]  ;;  %v3544_v49 = vld [vmem:[#allocation8 + $0xa4] sm:$0xf]  ;;  %v2968_v50 = vld [vmem:[#allocation8 + $0xa8] sm:$0xf0] }
 0x107   :  { %v1288_v23 = vunpack.c.h.bf16 %v1248_v8  ;;  %v1289_v25 = vunpack.c.l.bf16 %v1248_v8  ;;  %v3691_v35 = vpop.eup %3690  ;;  %v1263_v41 = vmul.f32 %v3689_v55, %v3965_v53  ;;  %2251 = vmatpush.bf16.msra.mxu1 %v2995_v33  ;;  %v2987_v2 = vor.u32 %v3548_v59, %v2984_v60  ;;  %v3643_v8 = vld [vmem:[#allocation8 + $0x3b4] sm:$0xf0]  ;;  %v3625_v55 = vld [vmem:[#allocation8 + $0x324] sm:$0xf0] }
 0x108   :  { %v1149_v29 = vxor.u32 2147516416, %v1141_v15  ;;  %v4019_v30 = vpack.c.bf16 %v1041_v16, %v1013_v56  ;;  %v1265_v45 = vmul.f32 %v3691_v35, %v3969_v58  ;;  %v3303_v56 = vor.u32 %v3629_v43, %v3302_v42  ;;  %v2912_v15 = vld [vmem:[#allocation8 + $0x38] sm:$0xf0]  ;;  %v3546_v16 = vld [vmem:[#allocation8 + $0xb4] sm:$0xf] }
 0x109   :  { %3692 = vrcp.f32 %v1288_v23  ;;  %v3295_v4 = vor.u32 %v3627_v63, %v3294_v5  ;;  %v3359_v13 = vor.u32 %v3643_v8, %v3358_v7  ;;  %v2915_v23 = vor.u32 %v3530_v9, %v2912_v15  ;;  %v3641_v42 = vld [vmem:[#allocation8 + $0x3a4] sm:$0xf0]  ;;  %v3528_v43 = vld [vmem:[#allocation8 + $0x24] sm:$0xf]  ;;  %v3278_v5 = vld [vmem:[#allocation8 + $0x310] sm:$0xf] }
 0x10a   :  { %3694 = vrcp.f32 %v1289_v25  ;;  %v1159_v46 = vunpack.c.l.bf16 %v1149_v29  ;;  %v1160_v47 = vunpack.c.h.bf16 %v1149_v29  ;;  %v1119_v52 = vunpack.c.l.bf16 %v4019_v30  ;;  %2210 = vmatpush.bf16.msrb.mxu2 %v3303_v56  ;;  %2224 = vmatpush.bf16.msrb.mxu3 %v3367_v57  ;;  %v3342_v8 = vld [vmem:[#allocation8 + $0x390] sm:$0xf]  ;;  %v3639_v9 = vld [vmem:[#allocation8 + $0x394] sm:$0xf0]  ;;  %v3526_v15 = vld [vmem:[#allocation8 + $0x14] sm:$0xf] }
 0x10b   :  { %v1120_v54 = vunpack.c.h.bf16 %v4019_v30  ;;  %v4026_v61 = vpack.c.bf16 %v1263_v41, %v1265_v45  ;;  %2238 = vmatpush.bf16.msra.mxu0 %v2923_v0  ;;  %2252 = vmatpush.bf16.msra.mxu1 %v2987_v2  ;;  %v2979_v51 = vor.u32 %v3546_v16, %v2976_v17  ;;  %v3287_v35 = vor.u32 %v3625_v55, %v3286_v28  ;;  %v3350_v41 = vld [vmem:[#allocation8 + $0x3a0] sm:$0xf]  ;;  %v2896_v16 = vld [vmem:[#allocation8 + $0x18] sm:$0xf0] }
 0x10c   :  { %v1179_v36 = vmul.f32 1.442695, %v1159_v46  ;;  %v1181_v40 = vmul.f32 1.442695, %v1160_v47  ;;  %v1135_v1 = vmul.f32 1.703125, %v1119_v52  ;;  %v3351_v47 = vor.u32 %v3641_v42, %v3350_v41 }
 0x10d   :  { %v1136_v37 = vmul.f32 1.703125, %v1120_v54  ;;  %v1311_v19 = vunpack.c.l.bf16 %v4026_v61  ;;  %v1312_v29 = vunpack.c.h.bf16 %v4026_v61  ;;  %v226_v59 = vperm.slane %v3933_v14, 7 }
 0x10e   :  { %3696 = vpow2.f32 %v1179_v36  ;;  %2211 = vmatpush.bf16.msrb.mxu2 %v3295_v4  ;;  %2225 = vmatpush.bf16.msrb.mxu3 %v3359_v13  ;;  %v2907_v60 = vor.u32 %v3528_v43, %v2904_v62  ;;  %v2971_v61 = vor.u32 %v3544_v49, %v2968_v50  ;;  %v3570_v49 = vld [vmem:[#allocation8 + $0x174] sm:$0xf]  ;;  %v3072_v50 = vld [vmem:[#allocation8 + $0x178] sm:$0xf0] }
 0x10f   :  { %v3693_v11 = vpop.eup %3692  ;;  %3698 = vpow2.f32 %v1181_v40  ;;  %v1145_v12 = vpack.c.bf16 %v1136_v37, %v1135_v1  ;;  %2239 = vmatpush.bf16.msra.mxu0 %v2915_v23  ;;  %2253 = vmatpush.bf16.msra.mxu1 %v2979_v51  ;;  %v1327_v57 = vmul.f32 %v1311_v19, %v1109_v32  ;;  %v1328_v63 = vmul.f32 %v1312_v29, %v1110_v38  ;;  %v3623_v32 = vld [vmem:[#allocation8 + $0x314] sm:$0xf0]  ;;  %v3334_v51 = vld [vmem:[#allocation8 + $0x380] sm:$0xf] }
 0x110   :  { %v3695_v18 = vpop.eup %3694  ;;  %v1291_v20 = vmul.f32 %v3693_v11, %v3965_v53  ;;  %v3279_v13 = vor.u32 %v3623_v32, %v3278_v5  ;;  %v3343_v19 = vor.u32 %v3639_v9, %v3342_v8  ;;  %v3064_v9 = vld [vmem:[#allocation8 + $0x168] sm:$0xf0] }
 0x111   :  { %v1293_v25 = vmul.f32 %v3695_v18, %v3969_v58  ;;  %v1153_v31 = vxor.u32 2147516416, %v1145_v12 }
 0x112   :  { %2212 = vmatpush.bf16.msrb.mxu2 %v3287_v35  ;;  %2226 = vmatpush.bf16.msrb.mxu3 %v3351_v47  ;;  %v3524_v35 = vld [vmem:[#allocation8 + $0x4] sm:$0xf] }
 0x113   :  { %v1294_v44 = vpack.c.bf16 %v1291_v20, %v1293_v25  ;;  %v1167_v45 = vunpack.c.l.bf16 %v1153_v31  ;;  %v1168_v46 = vunpack.c.h.bf16 %v1153_v31  ;;  %2240 = vmatpush.bf16.msra.mxu0 %v2907_v60  ;;  %2254 = vmatpush.bf16.msra.mxu1 %v2971_v61  ;;  %v2960_v20 = vld [vmem:[#allocation8 + $0x98] sm:$0xf0]  ;;  %v3270_v31 = vld [vmem:[#allocation8 + $0x300] sm:$0xf] }
 0x114   :  { %v3697_v56 = vpop.eup %3696  ;;  %v2963_v29 = vor.u32 %v3542_v27, %v2960_v20  ;;  %v3566_v20 = vld [vmem:[#allocation8 + $0x154] sm:$0xf] }
 0x115   :  { %v1052_v26 = vpop.f32.mrf.mxu0  ;;  %v3699_v36 = vpop.eup %3698  ;;  %v1319_v40 = vunpack.c.l.bf16 %v1294_v44  ;;  %v1320_v0 = vunpack.c.h.bf16 %v1294_v44  ;;  %v1195_v1 = vmul.f32 1.442695, %v1167_v45  ;;  %v1197_v37 = vmul.f32 1.442695, %v1168_v46  ;;  %v2888_v44 = vld [vmem:[#allocation8 + $0x8] sm:$0xf0] }
 0x116   :  { %v1053_v33 = vadd.f32 %v1052_v26, %v225_v24  ;;  %v1205_v4 = vpack.c.bf16 %v3699_v36, %v3697_v56  ;;  %2213 = vmatpush.bf16.msrb.mxu2 %v3279_v13  ;;  %v3621_v26 = vld [vmem:[#allocation8 + $0x304] sm:$0xf0]  ;;  %2227 = vmatpush.bf16.msrb.mxu3 %v3343_v19  ;;  %v3540_v45 = vld [vmem:[#allocation8 + $0x84] sm:$0xf]  ;;  %v2952_v46 = vld [vmem:[#allocation8 + $0x88] sm:$0xf0]  ;;  %v2891_v62 = vor.u32 %v3524_v35, %v2888_v44 }
 0x117   :  { %v1066_v2 = vpop.f32.mrf.mxu1  ;;  %v1335_v11 = vmul.f32 %v1319_v40, %v1117_v21  ;;  %v1336_v12 = vmul.f32 %v1320_v0, %v1118_v22  ;;  %3700 = vpow2.f32 %v1195_v1  ;;  %v2899_v22 = vor.u32 %v3526_v15, %v2896_v16  ;;  %2255 = vmatpush.bf16.msra.mxu1 %v2963_v29  ;;  %v3586_v56 = vld [vmem:[#allocation8 + $0x1f4] sm:$0xf]  ;;  %v3136_v0 = vld [vmem:[#allocation8 + $0x1f8] sm:$0xf0]  ;;  %v3048_v44 = vld [vmem:[#allocation8 + $0x148] sm:$0xf0] }
 0x118   :  { %v1067_v7 = vadd.f32 %v1066_v2, %v1053_v33  ;;  %v1215_v38 = vunpack.c.l.bf16 %v1205_v4  ;;  %v1216_v17 = vunpack.c.h.bf16 %v1205_v4  ;;  %3702 = vpow2.f32 %v1197_v37  ;;  %v3637_v33 = vld [vmem:[#allocation8 + $0x384] sm:$0xf0] }
 0x119   :  { %v4049_v21 = vpack.c.bf16 %v1335_v11, %v1327_v57  ;;  %v4051_v10 = vpack.c.bf16 %v1336_v12, %v1328_v63  ;;  %v3271_v42 = vor.u32 %v3621_v26, %v3270_v31  ;;  %v3335_v43 = vor.u32 %v3637_v33, %v3334_v51  ;;  %2241 = vmatpush.bf16.msra.mxu0 %v2899_v22  ;;  %v3568_v63 = vld [vmem:[#allocation8 + $0x164] sm:$0xf]  ;;  %v3128_v11 = vld [vmem:[#allocation8 + $0x1e8] sm:$0xf0]  ;;  %v3582_v51 = vld [vmem:[#allocation8 + $0x1d4] sm:$0xf] }
 0x11a   :  { %v1231_v28 = vadd.f32 1.0, %v1215_v38  ;;  %v1232_v55 = vadd.f32 1.0, %v1216_v17  ;;  %v2955_v36 = vor.u32 %v3540_v45, %v2952_v46  ;;  %v3075_v40 = vor.u32 %v3570_v49, %v3072_v50  ;;  %v3580_v49 = vld [vmem:[#allocation8 + $0x1c4] sm:$0xf]  ;;  %v3112_v50 = vld [vmem:[#allocation8 + $0x1c8] sm:$0xf0] }
 0x11b   :  { %v1080_v18 = vpop.f32.mrf.mxu2  ;;  %2159 = vmatmul.bf16.vlgmr.msra.gmra.mxu2 %v4049_v21  ;;  %2173 = vmatmul.bf16.vlgmr.msra.gmra.mxu3 %v4051_v10  ;;  %v3139_v5 = vor.u32 %v3586_v56, %v3136_v0  ;;  %v3067_v15 = vor.u32 %v3568_v63, %v3064_v9  ;;  %v3115_v0 = vor.u32 %v3580_v49, %v3112_v50  ;;  %v3040_v9 = vld [vmem:[#allocation8 + $0x138] sm:$0xf0] }
 0x11c   :  { %v1081_v23 = vadd.f32 %v1080_v18, %v226_v59  ;;  %v1245_v47 = vpack.c.bf16 %v1232_v55, %v1231_v28  ;;  %2214 = vmatpush.bf16.msrb.mxu2 %v3271_v42  ;;  %2228 = vmatpush.bf16.msrb.mxu3 %v3335_v43  ;;  %v3120_v28 = vld [vmem:[#allocation8 + $0x1d8] sm:$0xf0] }
 0x11d   :  { %v1094_v25 = vpop.f32.mrf.mxu3  ;;  %v3701_v57 = vpop.eup %3700  ;;  %2242 = vmatpush.bf16.msra.mxu0 %v2891_v62  ;;  %2256 = vmatpush.bf16.msra.mxu1 %v2955_v36 }
 0x11e   :  { %v1095_v41 = vadd.f32 %v1094_v25, %v1081_v23  ;;  %v1054_v61 = vpop.f32.mrf.mxu0  ;;  %v3703_v1 = vpop.eup %3702  ;;  %v1267_v37 = vunpack.c.h.bf16 %v1245_v47  ;;  %v1268_v2 = vunpack.c.l.bf16 %v1245_v47 }
 0x11f   :  { %v1209_v4 = vpack.c.bf16 %v3703_v1, %v3701_v57  ;;  %v1055_v12 = vadd.f32 %v1054_v61, %v225_v24  ;;  %v3056_v24 = vld [vmem:[#allocation8 + $0x158] sm:$0xf0]  ;;  %v1068_v22 = vpop.f32.mrf.mxu1 }
 0x120   :  { %v4055_v60 = vpack.c.bf16 %v1095_v41, %v1067_v7  ;;  %2263 = vmatpush.bf16.msra.mxu2 %v3075_v40  ;;  %v3584_v7 = vld [vmem:[#allocation8 + $0x1e4] sm:$0xf]  ;;  %3704 = vrcp.f32 %v1267_v37  ;;  %2277 = vmatpush.bf16.msra.mxu3 %v3139_v5  ;;  %v3059_v26 = vor.u32 %v3566_v20, %v3056_v24  ;;  %v3123_v41 = vor.u32 %v3582_v51, %v3120_v28  ;;  %v3562_v5 = vld [vmem:[#allocation8 + $0x134] sm:$0xf]  ;;  %v3096_v24 = vld [vmem:[#allocation8 + $0x1a8] sm:$0xf0] }
 0x121   :  { %v3131_v16 = vor.u32 %v3584_v7, %v3128_v11  ;;  %3706 = vrcp.f32 %v1268_v2  ;;  %v1223_v27 = vunpack.c.l.bf16 %v1209_v4  ;;  %v1224_v38 = vunpack.c.h.bf16 %v1209_v4  ;;  %v3578_v7 = vld [vmem:[#allocation8 + $0x1b4] sm:$0xf] }
 0x122   :  { %v1113_v32 = vunpack.c.l.bf16 %v4055_v60  ;;  %v1114_v8 = vunpack.c.h.bf16 %v4055_v60  ;;  %v1069_v29 = vadd.f32 %v1068_v22, %v1055_v12  ;;  %v3043_v11 = vor.u32 %v3562_v5, %v3040_v9  ;;  %v3104_v12 = vld [vmem:[#allocation8 + $0x1b8] sm:$0xf0]  ;;  %v3016_v5 = vld [vmem:[#allocation8 + $0x108] sm:$0xf0] }
 0x123   :  { %v1082_v13 = vpop.f32.mrf.mxu2  ;;  %v1239_v23 = vadd.f32 1.0, %v1223_v27  ;;  %v1240_v25 = vadd.f32 1.0, %v1224_v38  ;;  %v3560_v27 = vld [vmem:[#allocation8 + $0x124] sm:$0xf]  ;;  %v3032_v38 = vld [vmem:[#allocation8 + $0x128] sm:$0xf0] }
 0x124   :  { %v1129_v17 = vmul.f32 1.703125, %v1113_v32  ;;  %v1130_v18 = vmul.f32 1.703125, %v1114_v8  ;;  %v1083_v19 = vadd.f32 %v1082_v13, %v226_v59  ;;  %2264 = vmatpush.bf16.msra.mxu2 %v3067_v15  ;;  %2278 = vmatpush.bf16.msra.mxu3 %v3131_v16  ;;  %v3564_v59 = vld [vmem:[#allocation8 + $0x144] sm:$0xf]  ;;  %v3107_v15 = vor.u32 %v3578_v7, %v3104_v12  ;;  %v3080_v12 = vld [vmem:[#allocation8 + $0x188] sm:$0xf0] }
 0x125   :  { %v1096_v31 = vpop.f32.mrf.mxu3  ;;  %v1249_v35 = vpack.c.bf16 %v1240_v25, %v1239_v23  ;;  %v3051_v62 = vor.u32 %v3564_v59, %v3048_v44  ;;  %v3035_v20 = vor.u32 %v3560_v27, %v3032_v38  ;;  %v3600_v38 = vld [vmem:[#allocation8 + $0x264] sm:$0xf] }
 0x126   :  { %v1142_v55 = vpack.c.bf16 %v1130_v18, %v1129_v17  ;;  %v1097_v33 = vadd.f32 %v1096_v31, %v1083_v19  ;;  %v3705_v42 = vpop.eup %3704  ;;  %v3576_v17 = vld [vmem:[#allocation8 + $0x1a4] sm:$0xf] }
 0x127   :  { %v3707_v45 = vpop.eup %3706  ;;  %v1295_v46 = vunpack.c.h.bf16 %v1249_v35  ;;  %v1296_v47 = vunpack.c.l.bf16 %v1249_v35  ;;  %v1270_v36 = vmul.f32 %v3705_v42, %v3965_v53  ;;  %v3099_v51 = vor.u32 %v3576_v17, %v3096_v24  ;;  %v3024_v35 = vld [vmem:[#allocation8 + $0x118] sm:$0xf0] }
 0x128   :  { %v1150_v43 = vxor.u32 2147516416, %v1142_v55  ;;  %v4067_v14 = vpack.c.bf16 %v1097_v33, %v1069_v29  ;;  %2265 = vmatpush.bf16.msra.mxu2 %v3059_v26  ;;  %2279 = vmatpush.bf16.msra.mxu3 %v3123_v41  ;;  %v1272_v1 = vmul.f32 %v3707_v45, %v3969_v58  ;;  %v3558_v33 = vld [vmem:[#allocation8 + $0x114] sm:$0xf] }
 0x129   :  { %3708 = vrcp.f32 %v1295_v46  ;;  %v3574_v41 = vld [vmem:[#allocation8 + $0x194] sm:$0xf]  ;;  %v3027_v45 = vor.u32 %v3558_v33, %v3024_v35  ;;  %v3088_v46 = vld [vmem:[#allocation8 + $0x198] sm:$0xf0] }
 0x12a   :  { %v1161_v56 = vunpack.c.l.bf16 %v1150_v43  ;;  %v1162_v57 = vunpack.c.h.bf16 %v1150_v43  ;;  %v1121_v61 = vunpack.c.l.bf16 %v4067_v14  ;;  %v1122_v40 = vunpack.c.h.bf16 %v4067_v14  ;;  %v3312_v14 = vld [vmem:[#allocation8 + $0x358] sm:$0xf0] }
 0x12b   :  { %3710 = vrcp.f32 %v1296_v47  ;;  %v1273_v16 = vpack.c.bf16 %v1270_v36, %v1272_v1  ;;  %v3264_v36 = vld [vmem:[#allocation8 + $0x2f8] sm:$0xf0] }
 0x12c   :  { %v1183_v37 = vmul.f32 1.442695, %v1161_v56  ;;  %v1185_v2 = vmul.f32 1.442695, %v1162_v57  ;;  %v1137_v63 = vmul.f32 1.703125, %v1121_v61  ;;  %v1138_v4 = vmul.f32 1.703125, %v1122_v40  ;;  %2266 = vmatpush.bf16.msra.mxu2 %v3051_v62  ;;  %2280 = vmatpush.bf16.msra.mxu3 %v3115_v0 }
 0x12d   :  { %v1313_v55 = vunpack.c.l.bf16 %v1273_v16  ;;  %v1314_v29 = vunpack.c.h.bf16 %v1273_v16  ;;  %v3602_v62 = vld [vmem:[#allocation8 + $0x274] sm:$0xf]  ;;  %v3200_v56 = vld [vmem:[#allocation8 + $0x278] sm:$0xf0]  ;;  %v3091_v0 = vor.u32 %v3574_v41, %v3088_v46  ;;  %v3240_v46 = vld [vmem:[#allocation8 + $0x2c8] sm:$0xf0] }
 0x12e   :  { %3712 = vpow2.f32 %v1183_v37  ;;  %v1146_v13 = vpack.c.bf16 %v1138_v4, %v1137_v63  ;;  %v3618_v57 = vld [vmem:[#allocation8 + $0x2f4] sm:$0xf]  ;;  %v3572_v63 = vld [vmem:[#allocation8 + $0x184] sm:$0xf]  ;;  %v3203_v16 = vor.u32 %v3602_v62, %v3200_v56 }
 0x12f   :  { %3714 = vpow2.f32 %v1185_v2  ;;  %v3709_v18 = vpop.eup %3708  ;;  %v3556_v2 = vld [vmem:[#allocation8 + $0x104] sm:$0xf]  ;;  %v1329_v4 = vmul.f32 %v1313_v55, %v1111_v39  ;;  %v1330_v9 = vmul.f32 %v1314_v29, %v1112_v48  ;;  %v3267_v27 = vor.u32 %v3618_v57, %v3264_v36  ;;  %v3192_v39 = vld [vmem:[#allocation8 + $0x268] sm:$0xf0]  ;;  %v3248_v55 = vld [vmem:[#allocation8 + $0x2d8] sm:$0xf0] }
 0x130   :  { %v1154_v19 = vxor.u32 2147516416, %v1146_v13  ;;  %2267 = vmatpush.bf16.msra.mxu2 %v3043_v11  ;;  %v1298_v25 = vmul.f32 %v3709_v18, %v3965_v53  ;;  %2281 = vmatpush.bf16.msra.mxu3 %v3107_v15  ;;  %v3256_v48 = vld [vmem:[#allocation8 + $0x2e8] sm:$0xf0] }
 0x131   :  { %v3711_v23 = vpop.eup %3710 }
 0x132   :  { %v1300_v22 = vmul.f32 %v3711_v23, %v3969_v58  ;;  %v1169_v31 = vunpack.c.l.bf16 %v1154_v19  ;;  %v1170_v26 = vunpack.c.h.bf16 %v1154_v19  ;;  %v3019_v19 = vor.u32 %v3556_v2, %v3016_v5 }
 0x134   :  { %v3713_v28 = vpop.eup %3712  ;;  %v1301_v43 = vpack.c.bf16 %v1298_v25, %v1300_v22  ;;  %v1199_v59 = vmul.f32 1.442695, %v1169_v31  ;;  %v1201_v44 = vmul.f32 1.442695, %v1170_v26  ;;  %2268 = vmatpush.bf16.msra.mxu2 %v3035_v20  ;;  %2282 = vmatpush.bf16.msra.mxu3 %v3099_v51  ;;  %v3195_v25 = vor.u32 %v3600_v38, %v3192_v39  ;;  %v3598_v31 = vld [vmem:[#allocation8 + $0x254] sm:$0xf] }
 0x135   :  { %v3715_v42 = vpop.eup %3714  ;;  %v3259_v22 = vor.u32 %v3616_v34, %v3256_v48  ;;  %v3184_v51 = vld [vmem:[#allocation8 + $0x258] sm:$0xf0]  ;;  %v3606_v48 = vld [vmem:[#allocation8 + $0x294] sm:$0xf] }
 0x136   :  { %v1206_v47 = vpack.c.bf16 %v3715_v42, %v3713_v28  ;;  %v1321_v49 = vunpack.c.l.bf16 %v1301_v43  ;;  %v1322_v50 = vunpack.c.h.bf16 %v1301_v43  ;;  %3716 = vpow2.f32 %v1199_v59  ;;  %v3614_v28 = vld [vmem:[#allocation8 + $0x2d4] sm:$0xf]  ;;  %v3596_v42 = vld [vmem:[#allocation8 + $0x244] sm:$0xf]  ;;  %v3176_v43 = vld [vmem:[#allocation8 + $0x248] sm:$0xf0] }
 0x137   :  { %3718 = vpow2.f32 %v1201_v44  ;;  %v3187_v35 = vor.u32 %v3598_v31, %v3184_v51  ;;  %v3251_v41 = vor.u32 %v3614_v28, %v3248_v55  ;;  %v3179_v62 = vor.u32 %v3596_v42, %v3176_v43  ;;  %v3152_v34 = vld [vmem:[#allocation8 + $0x218] sm:$0xf0]  ;;  %v3604_v31 = vld [vmem:[#allocation8 + $0x284] sm:$0xf]  ;;  %v3634_v51 = vld [vmem:[#allocation8 + $0x374] sm:$0xf] }
 0x138   :  { %v1217_v1 = vunpack.c.l.bf16 %v1206_v47  ;;  %v1218_v37 = vunpack.c.h.bf16 %v1206_v47  ;;  %v1337_v7 = vmul.f32 %v1321_v49, %v1119_v52  ;;  %v1338_v11 = vmul.f32 %v1322_v50, %v1120_v54  ;;  %2269 = vmatpush.bf16.msra.mxu2 %v3027_v45  ;;  %2283 = vmatpush.bf16.msra.mxu3 %v3091_v0  ;;  %v3612_v45 = vld [vmem:[#allocation8 + $0x2c4] sm:$0xf]  ;;  %v3594_v50 = vld [vmem:[#allocation8 + $0x234] sm:$0xf]  ;;  %v3168_v0 = vld [vmem:[#allocation8 + $0x238] sm:$0xf0] }
 0x139   :  { %v3083_v52 = vor.u32 %v3572_v63, %v3080_v12  ;;  %v3243_v49 = vor.u32 %v3612_v45, %v3240_v46  ;;  %v3171_v5 = vor.u32 %v3594_v50, %v3168_v0  ;;  %v3608_v12 = vld [vmem:[#allocation8 + $0x2a4] sm:$0xf] }
 0x13a   :  { %v1233_v13 = vadd.f32 1.0, %v1217_v1  ;;  %v1234_v15 = vadd.f32 1.0, %v1218_v37  ;;  %v4087_v17 = vpack.c.bf16 %v1337_v7, %v1329_v4  ;;  %v4089_v18 = vpack.c.bf16 %v1338_v11, %v1330_v9  ;;  %v3610_v1 = vld [vmem:[#allocation8 + $0x2b4] sm:$0xf]  ;;  %v3232_v37 = vld [vmem:[#allocation8 + $0x2b8] sm:$0xf0] }
 0x13b   :  { %v3235_v63 = vor.u32 %v3610_v1, %v3232_v37  ;;  %v3592_v4 = vld [vmem:[#allocation8 + $0x224] sm:$0xf]  ;;  %v3160_v11 = vld [vmem:[#allocation8 + $0x228] sm:$0xf0] }
 0x13c   :  { %v1246_v20 = vpack.c.bf16 %v1234_v15, %v1233_v13  ;;  %v3717_v30 = vpop.eup %3716  ;;  %2187 = vmatmul.bf16.vlgmr.msrb.gmra.mxu0 %v4087_v17  ;;  %2201 = vmatmul.bf16.vlgmr.msrb.gmra.mxu1 %v4089_v18  ;;  %v3224_v13 = vld [vmem:[#allocation8 + $0x2a8] sm:$0xf0]  ;;  %v3163_v15 = vor.u32 %v3592_v4, %v3160_v11  ;;  %v3632_v46 = vld [vmem:[#allocation8 + $0x364] sm:$0xf]  ;;  %v3626_v4 = vld [vmem:[#allocation8 + $0x334] sm:$0xf] }
 0x13d   :  { %v3719_v54 = vpop.eup %3718  ;;  %2291 = vmatpush.bf16.msrb.mxu0 %v3203_v16  ;;  %2305 = vmatpush.bf16.msrb.mxu1 %v3267_v27  ;;  %v3227_v16 = vor.u32 %v3608_v12, %v3224_v13  ;;  %v3590_v27 = vld [vmem:[#allocation8 + $0x214] sm:$0xf]  ;;  %v3648_v50 = vld [vmem:[#allocation8 + $0x3e4] sm:$0xf]  ;;  %v3304_v1 = vld [vmem:[#allocation8 + $0x348] sm:$0xf0] }
 0x13e   :  { %v1274_v24 = vunpack.c.h.bf16 %v1246_v20  ;;  %v1275_v23 = vunpack.c.l.bf16 %v1246_v20  ;;  %v1210_v26 = vpack.c.bf16 %v3719_v54, %v3717_v30  ;;  %2270 = vmatpush.bf16.msra.mxu2 %v3019_v19  ;;  %2284 = vmatpush.bf16.msra.mxu3 %v3083_v52  ;;  %v3216_v19 = vld [vmem:[#allocation8 + $0x298] sm:$0xf0]  ;;  %v3628_v0 = vld [vmem:[#allocation8 + $0x344] sm:$0xf]  ;;  %v3288_v13 = vld [vmem:[#allocation8 + $0x328] sm:$0xf0] }
 0x13f   :  { %v3219_v54 = vor.u32 %v3606_v48, %v3216_v19  ;;  %v3644_v37 = vld [vmem:[#allocation8 + $0x3c4] sm:$0xf]  ;;  %v3638_v48 = vld [vmem:[#allocation8 + $0x394] sm:$0xf]  ;;  %v3344_v19 = vld [vmem:[#allocation8 + $0x398] sm:$0xf0] }
 0x140   :  { %3720 = vrcp.f32 %v1274_v24  ;;  %v1225_v29 = vunpack.c.l.bf16 %v1210_v26  ;;  %v1226_v33 = vunpack.c.h.bf16 %v1210_v26  ;;  %v3208_v26 = vld [vmem:[#allocation8 + $0x288] sm:$0xf0]  ;;  %v3624_v12 = vld [vmem:[#allocation8 + $0x324] sm:$0xf] }
 0x141   :  { %3722 = vrcp.f32 %v1275_v23  ;;  %2292 = vmatpush.bf16.msrb.mxu0 %v3195_v25  ;;  %2306 = vmatpush.bf16.msrb.mxu1 %v3259_v22  ;;  %v3144_v22 = vld [vmem:[#allocation8 + $0x208] sm:$0xf0] }
 0x142   :  { %v1241_v59 = vadd.f32 1.0, %v1225_v29  ;;  %v1242_v44 = vadd.f32 1.0, %v1226_v33  ;;  %v3328_v29 = vld [vmem:[#allocation8 + $0x378] sm:$0xf0]  ;;  %v3650_v33 = vld [vmem:[#allocation8 + $0x3f4] sm:$0xf] }
 0x144   :  { %v1250_v47 = vpack.c.bf16 %v1242_v44, %v1241_v59  ;;  %v3331_v44 = vor.u32 %v3634_v51, %v3328_v29 }
 0x145   :  { %2293 = vmatpush.bf16.msrb.mxu0 %v3187_v35  ;;  %2307 = vmatpush.bf16.msrb.mxu1 %v3251_v41  ;;  %v3392_v35 = vld [vmem:[#allocation8 + $0x3f8] sm:$0xf0] }
 0x146   :  { %v3721_v56 = vpop.eup %3720  ;;  %v1302_v57 = vunpack.c.h.bf16 %v1250_v47  ;;  %v1303_v36 = vunpack.c.l.bf16 %v1250_v47  ;;  %v3395_v45 = vor.u32 %v3650_v33, %v3392_v35 }
 0x147   :  { %v3723_v2 = vpop.eup %3722  ;;  %v1277_v9 = vmul.f32 %v3721_v56, %v3965_v53  ;;  %v3384_v56 = vld [vmem:[#allocation8 + $0x3e8] sm:$0xf0] }
 0x148   :  { %3724 = vrcp.f32 %v1302_v57  ;;  %v1279_v7 = vmul.f32 %v3723_v2, %v3969_v58  ;;  %v3368_v2 = vld [vmem:[#allocation8 + $0x3c8] sm:$0xf0] }
 0x149   :  { %3726 = vrcp.f32 %v1303_v36  ;;  %2294 = vmatpush.bf16.msrb.mxu0 %v3179_v62  ;;  %2308 = vmatpush.bf16.msrb.mxu1 %v3243_v49  ;;  %v3320_v49 = vld [vmem:[#allocation8 + $0x368] sm:$0xf0] }
 0x14a   :  { %v1280_v39 = vpack.c.bf16 %v1277_v9, %v1279_v7  ;;  %v3323_v60 = vor.u32 %v3632_v46, %v3320_v49  ;;  %v3296_v9 = vld [vmem:[#allocation8 + $0x338] sm:$0xf0] }
 0x14b   :  { %v3360_v7 = vld [vmem:[#allocation8 + $0x3b8] sm:$0xf0] }
 0x14c   :  { %2243 = vmatmul.bf16.vlgmr.msra.gmra.mxu0 %v4001_v6  ;;  %2257 = vmatmul.bf16.vlgmr.msra.gmra.mxu1 %v4003_v3  ;;  %v3155_v6 = vor.u32 %v3590_v27, %v3152_v34  ;;  %v3588_v3 = vld [vmem:[#allocation8 + $0x204] sm:$0xf]  ;;  %v1315_v24 = vunpack.c.l.bf16 %v1280_v39  ;;  %v1316_v23 = vunpack.c.h.bf16 %v1280_v39  ;;  %v3291_v27 = vor.u32 %v3624_v12, %v3288_v13  ;;  %v3622_v39 = vld [vmem:[#allocation8 + $0x314] sm:$0xf]  ;;  %v3280_v34 = vld [vmem:[#allocation8 + $0x318] sm:$0xf0] }
 0x14d   :  { %2295 = vmatpush.bf16.msrb.mxu0 %v3171_v5  ;;  %2309 = vmatpush.bf16.msrb.mxu1 %v3235_v63  ;;  %v3307_v5 = vor.u32 %v3628_v0, %v3304_v1  ;;  %v3371_v63 = vor.u32 %v3644_v37, %v3368_v2 }
 0x14e   :  { %v3725_v38 = vpop.eup %3724  ;;  %v1331_v41 = vmul.f32 %v1315_v24, %v1113_v32  ;;  %v1332_v42 = vmul.f32 %v1316_v23, %v1114_v8  ;;  %v3387_v32 = vor.u32 %v3648_v50, %v3384_v56  ;;  %v3630_v8 = vld [vmem:[#allocation8 + $0x354] sm:$0xf] }
 0x14f   :  { %v3727_v52 = vpop.eup %3726  ;;  %v1305_v20 = vmul.f32 %v3725_v38, %v3965_v53  ;;  %v3147_v53 = vor.u32 %v3588_v3, %v3144_v22  ;;  %v3315_v57 = vor.u32 %v3630_v8, %v3312_v14  ;;  %v3336_v3 = vld [vmem:[#allocation8 + $0x388] sm:$0xf0]  ;;  %v1477_v22 = vld [vmem:[%s4132_s4] sm:$0x3]  ;;  %s3867_s4 = smov [#allocation10]  }
 0x150   :  { %v1307_v30 = vmul.f32 %v3727_v52, %v3969_v58  ;;  %v3211_v58 = vor.u32 %v3604_v31, %v3208_v26  ;;  %v3283_v52 = vor.u32 %v3622_v39, %v3280_v34  ;;  %v1479_v31 = vperm.slane %v1477_v22, 0  ;;  %s2355_s17 = sshll.u32 %s3867_s4, 4  ;;  %s2356_s17 = int_to_ptr.vmem [resolvable:$true] %s2355_s17 }
 0x151   :  { %2296 = vmatpush.bf16.msrb.mxu0 %v3163_v15  ;;  %2310 = vmatpush.bf16.msrb.mxu1 %v3227_v16  ;;  %v3640_v15 = vld [vmem:[#allocation8 + $0x3a4] sm:$0xf]  ;;  %v3352_v16 = vld [vmem:[#allocation8 + $0x3a8] sm:$0xf0]  ;;  %v1480_v0 = vperm.slane %v1477_v22, 1 }
 0x152   :  { %v1308_v25 = vpack.c.bf16 %v1305_v20, %v1307_v30  ;;  %v3355_v38 = vor.u32 %v3640_v15, %v3352_v16  ;;  %v3347_v20 = vor.u32 %v3638_v48, %v3344_v19  ;;  %v3620_v30 = vld [vmem:[#allocation8 + $0x304] sm:$0xf] }
 0x154   :  { %v1323_v28 = vunpack.c.l.bf16 %v1308_v25  ;;  %v1324_v55 = vunpack.c.h.bf16 %v1308_v25 }
 0x155   :  { %2297 = vmatpush.bf16.msrb.mxu0 %v3155_v6  ;;  %2311 = vmatpush.bf16.msrb.mxu1 %v3219_v54  ;;  %v3272_v6 = vld [vmem:[#allocation8 + $0x308] sm:$0xf0]  ;;  %v3636_v54 = vld [vmem:[#allocation8 + $0x384] sm:$0xf] }
 0x156   :  { %v1339_v43 = vmul.f32 %v1323_v28, %v1121_v61  ;;  %v1340_v59 = vmul.f32 %v1324_v55, %v1122_v40  ;;  %v3646_v61 = vld [vmem:[#allocation8 + $0x3d4] sm:$0xf]  ;;  %v3376_v40 = vld [vmem:[#allocation8 + $0x3d8] sm:$0xf0] }
 0x157   :  { %v3379_v36 = vor.u32 %v3646_v61, %v3376_v40 }
 0x158   :  { %v4107_v47 = vpack.c.bf16 %v1339_v43, %v1331_v41  ;;  %v4109_v62 = vpack.c.bf16 %v1340_v59, %v1332_v42 }
 0x159   :  { %2298 = vmatpush.bf16.msrb.mxu0 %v3147_v53  ;;  %2312 = vmatpush.bf16.msrb.mxu1 %v3211_v58 }
 0x15a   :  { %2215 = vmatmul.bf16.vlgmr.msrb.gmra.mxu2 %v4107_v47  ;;  %2229 = vmatmul.bf16.vlgmr.msrb.gmra.mxu3 %v4109_v62 }
 0x15b   :  { %2319 = vmatpush.bf16.msrb.mxu2 %v3331_v44  ;;  %2333 = vmatpush.bf16.msrb.mxu3 %v3395_v45 }
 0x15c   :  { %2299 = vmatmul.bf16.vlgmr.msrb.gmra.mxu0 %v4087_v17  ;;  %2313 = vmatmul.bf16.vlgmr.msrb.gmra.mxu1 %v4089_v18  ;;  %v3642_v17 = vld [vmem:[#allocation8 + $0x3b4] sm:$0xf]  ;;  %v3299_v18 = vor.u32 %v3626_v4, %v3296_v9 }
 0x15d   :  { %v3363_v11 = vor.u32 %v3642_v17, %v3360_v7 }
 0x15f   :  { %2320 = vmatpush.bf16.msrb.mxu2 %v3323_v60  ;;  %2334 = vmatpush.bf16.msrb.mxu3 %v3387_v32 }
 0x163   :  { %2321 = vmatpush.bf16.msrb.mxu2 %v3315_v57  ;;  %2335 = vmatpush.bf16.msrb.mxu3 %v3379_v36 }
 0x167   :  { %2322 = vmatpush.bf16.msrb.mxu2 %v3307_v5  ;;  %2336 = vmatpush.bf16.msrb.mxu3 %v3371_v63 }
 0x16a   :  { %2271 = vmatmul.bf16.vlgmr.msra.gmra.mxu2 %v4049_v21  ;;  %2285 = vmatmul.bf16.vlgmr.msra.gmra.mxu3 %v4051_v10  ;;  %v3275_v21 = vor.u32 %v3620_v30, %v3272_v6  ;;  %v3339_v10 = vor.u32 %v3636_v54, %v3336_v3 }
 0x16b   :  { %2323 = vmatpush.bf16.msrb.mxu2 %v3299_v18  ;;  %2337 = vmatpush.bf16.msrb.mxu3 %v3363_v11 }
 0x16f   :  { %2324 = vmatpush.bf16.msrb.mxu2 %v3291_v27  ;;  %2338 = vmatpush.bf16.msrb.mxu3 %v3355_v38 }
 0x173   :  { %2325 = vmatpush.bf16.msrb.mxu2 %v3283_v52  ;;  %2339 = vmatpush.bf16.msrb.mxu3 %v3347_v20 }
 0x177   :  { %2326 = vmatpush.bf16.msrb.mxu2 %v3275_v21  ;;  %2340 = vmatpush.bf16.msrb.mxu3 %v3339_v10 }
 0x178   :  { %v2132_v24 = vpop.f32.mrf.mxu0  ;;  %v2146_v23 = vpop.f32.mrf.mxu1 }
 0x179   :  { %v2133_v55 = vadd.f32 %v2132_v24, %v1479_v31 }
 0x17a   :  { %2327 = vmatmul.bf16.vlgmr.msrb.gmra.mxu2 %v4107_v47  ;;  %2341 = vmatmul.bf16.vlgmr.msrb.gmra.mxu3 %v4109_v62 }
 0x17b   :  { %v2147_v33 = vadd.f32 %v2146_v23, %v2133_v55 }
 0x180   :  { %v2134_v25 = vpop.f32.mrf.mxu0  ;;  %v2148_v26 = vpop.f32.mrf.mxu1 }
 0x181   :  { %v2135_v58 = vadd.f32 %v2134_v25, %v1479_v31 }
 0x183   :  { %v2149_v44 = vadd.f32 %v2148_v26, %v2135_v58 }
 0x19e   :  { %v2160_v51 = vpop.f32.mrf.mxu2  ;;  %v2174_v28 = vpop.f32.mrf.mxu3 }
 0x19f   :  { %v2161_v53 = vadd.f32 %v2160_v51, %v2147_v33 }
 0x1a1   :  { %v2175_v43 = vadd.f32 %v2174_v28, %v2161_v53 }
 0x1a6   :  { %v2162_v41 = vpop.f32.mrf.mxu2  ;;  %v2176_v42 = vpop.f32.mrf.mxu3 }
 0x1a7   :  { %v2163_v46 = vadd.f32 %v2162_v41, %v2149_v44 }
 0x1a9   :  { %v2177_v56 = vadd.f32 %v2176_v42, %v2163_v46 }
 0x1b9   :  { %v2188_v29 = vpop.f32.mrf.mxu0  ;;  %v2202_v35 = vpop.f32.mrf.mxu1 }
 0x1ba   :  { %v2189_v45 = vadd.f32 %v2188_v29, %v2175_v43 }
 0x1bc   :  { %v2203_v62 = vadd.f32 %v2202_v35, %v2189_v45 }
 0x1c1   :  { %v2190_v59 = vpop.f32.mrf.mxu0  ;;  %v2204_v47 = vpop.f32.mrf.mxu1 }
 0x1c2   :  { %v2191_v32 = vadd.f32 %v2190_v59, %v2177_v56 }
 0x1c4   :  { %v2205_v61 = vadd.f32 %v2204_v47, %v2191_v32 }
 0x1c9   :  { %v2244_v8 = vpop.f32.mrf.mxu0  ;;  %v2258_v40 = vpop.f32.mrf.mxu1 }
 0x1ca   :  { %v2245_v2 = vadd.f32 %v2244_v8, %v1480_v0 }
 0x1cc   :  { %v2259_v9 = vadd.f32 %v2258_v40, %v2245_v2 }
 0x1d1   :  { %v2246_v5 = vpop.f32.mrf.mxu0  ;;  %v2260_v17 = vpop.f32.mrf.mxu1 }
 0x1d2   :  { %v2247_v18 = vadd.f32 %v2246_v5, %v1480_v0 }
 0x1d4   :  { %v2261_v16 = vadd.f32 %v2260_v17, %v2247_v18 }
 0x1d9   :  { %v2300_v11 = vpop.f32.mrf.mxu0  ;;  %v2314_v39 = vpop.f32.mrf.mxu1 }
 0x1dd   :  { %v2216_v49 = vpop.f32.mrf.mxu2  ;;  %v2230_v50 = vpop.f32.mrf.mxu3 }
 0x1de   :  { %v2217_v60 = vadd.f32 %v2216_v49, %v2203_v62 }
 0x1e0   :  { %v2231_v14 = vadd.f32 %v2230_v50, %v2217_v60 }
 0x1e1   :  { %v2302_v30 = vpop.f32.mrf.mxu0  ;;  %v2316_v3 = vpop.f32.mrf.mxu1 }
 0x1e2   :  { %2347 = vst [vmem:[#allocation10] sm:$0xff] %v2231_v14 }
 0x1e5   :  { %v2218_v57 = vpop.f32.mrf.mxu2  ;;  %v2232_v36 = vpop.f32.mrf.mxu3 }
 0x1e6   :  { %v2219_v1 = vadd.f32 %v2218_v57, %v2205_v61 }
 0x1e8   :  { %v2233_v37 = vadd.f32 %v2232_v36, %v2219_v1 }
 0x1ea   :  { %2349 = vst [vmem:[#allocation10 + $0x10] sm:$0xff] %v2233_v37 }
 0x1ed   :  { %v2272_v63 = vpop.f32.mrf.mxu2  ;;  %v2286_v4 = vpop.f32.mrf.mxu3 }
 0x1ee   :  { %v2273_v7 = vadd.f32 %v2272_v63, %v2259_v9 }
 0x1f0   :  { %v2287_v12 = vadd.f32 %v2286_v4, %v2273_v7 }
 0x1f2   :  { %v2301_v27 = vadd.f32 %v2300_v11, %v2287_v12 }
 0x1f4   :  { %v2315_v48 = vadd.f32 %v2314_v39, %v2301_v27 }
 0x1f5   :  { %v2274_v13 = vpop.f32.mrf.mxu2  ;;  %v2288_v15 = vpop.f32.mrf.mxu3 }
 0x1f6   :  { %v2275_v38 = vadd.f32 %v2274_v13, %v2261_v16 }
 0x1f8   :  { %v2289_v34 = vadd.f32 %v2288_v15, %v2275_v38 }
 0x1fa   :  { %v2303_v6 = vadd.f32 %v2302_v30, %v2289_v34 }
 0x1fc   :  { %v2317_v21 = vadd.f32 %v2316_v3, %v2303_v6 }
 0x1fd   :  { %v2328_v19 = vpop.f32.mrf.mxu2  ;;  %v2342_v52 = vpop.f32.mrf.mxu3 }
 0x1fe   :  { %v2329_v20 = vadd.f32 %v2328_v19, %v2315_v48 }
 0x200   :  { %v2343_v54 = vadd.f32 %v2342_v52, %v2329_v20 }
 0x202   :  { %2348 = vst [vmem:[#allocation10 + $0x8] sm:$0xff] %v2343_v54 }
 0x205   :  { %v2330_v10 = vpop.f32.mrf.mxu2  ;;  %v2344_v23 = vpop.f32.mrf.mxu3 }
 0x206   :  { %v2331_v24 = vadd.f32 %v2330_v10, %v2317_v21 }
 0x208   :  { %v2345_v25 = vadd.f32 %v2344_v23, %v2331_v24 }
 0x20a   :  { %2350 = vst [vmem:[#allocation10 + $0x18] sm:$0xff] %v2345_v25 }
 0x20b   :  { %2363 = dma.vmem_to_hbm [thread:$0]  %s2356_s17, 512, %s2358_s20, [#allocation4], %s3860_s30, %s3860_s30, %s3861_s6  }
 0x20c   :  { %3854 = dma.done.wait [#allocation4], 512  }
 0x20d   :  { %3855 = vsyncadd [#allocation4], 4294966784 }
 0x20e   :  { %2368 = vsyncpa [#allocation3], 1 }
 0x20f   :  { %2369 = vsyncpa [#allocation6], 1 }
 0x210   :  { %2370 = vsyncpa [#allocation9], 1 }
 0x211   :  { %2371 = vsyncpa [#allocation4], 1 }

</bundles_post_ra>
